<compile_context>
chip_gen: v5e
topology: v5e:2x2
jax: 0.10.0
libtpu: 0.0.40
codegen_flags: <defaults>
</compile_context>

<pallas_src>
import functools

import jax
import jax.numpy as jnp
from jax.experimental import pallas as pl
from jax.experimental.pallas import tpu as pltpu


# --------------------------------------------------------------------------- padding / packing
def _round_up(v, m):
    return ((v + m - 1) // m) * m


def _pad2(a, rows, cols):
    return jnp.pad(a, ((0, rows - a.shape[0]), (0, cols - a.shape[1]))).astype(jnp.float32)


def _block_pad_rows(w, h, hp, out_cols):
    """[nb*h, c] -> [nb*hp, out_cols]: zero-pad each h-row block to hp rows, cols to out_cols."""
    nb, c = w.shape[0] // h, w.shape[1]
    w = w.reshape(nb, h, c)
    w = jnp.pad(w, ((0, 0), (0, hp - h), (0, out_cols - c)))
    return w.reshape(nb * hp, out_cols).astype(jnp.float32)


_BIAS_ROWS = 8  # each bias occupies one sublane-aligned 8-row block in the bias slab


def _pick_vmem_limit():
    # ~85% of physical VMEM (v5e/v6e: ~109 MiB, v7x: ~54 MiB), leaving headroom for Mosaic scratch.
    try:
        return int(pltpu.get_tpu_info().vmem_capacity_bytes * 0.85)
    except Exception:
        return 64 * 1024 * 1024


# --------------------------------------------------------------------------- fused kernel
def _fused_kernel(x_ref, adj_ref, pool_ref, wh_ref, wp_ref, b_ref,
                  o_ref, pre_all, emb_all, *, n_layers, hp, idp, outp, eps):
    L, HP = n_layers, hp

    def bias(idx, width):
        # [1, width] row, broadcast against [NP, width] activations
        return b_ref[pl.ds(_BIAS_ROWS * idx, 1), pl.ds(0, width)]

    def gin_pre(xb):
        # (1 + eps) * x_block + sum_{j->i} x_j ; adjacency indexed at the use site (no hoisted copy)
        agg = jnp.dot(adj_ref[...], xb, preferred_element_type=jnp.float32)
        return xb + agg if eps == 0.0 else (1.0 + eps) * xb + agg

    # ---- pre_mp: Linear(input_dim, hidden) ----
    x = jnp.dot(x_ref[...], wh_ref[pl.ds(0, idp), :],
                preferred_element_type=jnp.float32) + bias(0, HP)
    emb_all[:, pl.ds(0, HP)] = x
    pre_all[:, pl.ds(0, HP)] = gin_pre(x)

    # ---- L GIN layers with learnable skip (sigmoid gate pre-folded into w1 row blocks) ----
    row = idp
    for i in range(L):
        # growing-input w1 matmul accumulated over aligned HP-wide blocks of the cached aggregates
        acc = None
        for j in range(i + 1):
            blk = jnp.dot(pre_all[:, pl.ds(j * HP, HP)],
                          wh_ref[pl.ds(row + j * HP, HP), :],
                          preferred_element_type=jnp.float32)
            acc = blk if acc is None else acc + blk
        row += (i + 1) * HP
        h = jnp.maximum(acc + bias(1 + 2 * i, HP), 0.0)
        xg = jnp.maximum(jnp.dot(h, wh_ref[pl.ds(row, HP), :],
                                 preferred_element_type=jnp.float32) + bias(2 + 2 * i, HP), 0.0)
        row += HP
        emb_all[:, pl.ds((i + 1) * HP, HP)] = xg
        if i + 1 < L:                               # the last layer's aggregate is never read
            pre_all[:, pl.ds((i + 1) * HP, HP)] = gin_pre(xg)

    # ---- global_add_pool: ONE wide matmul over the full emb scratch ----
    pooled = jnp.dot(pool_ref[...], emb_all[...], preferred_element_type=jnp.float32)

    # ---- post_mp on the pooled [G, (L+1)*HP] embedding (Dropout is identity in eval mode) ----
    r = 0
    h = jnp.dot(pooled, wp_ref[pl.ds(r, (L + 1) * HP), pl.ds(0, HP)],
                preferred_element_type=jnp.float32) + bias(2 * L + 1, HP)
    h = jnp.where(h > 0, h, 0.1 * h)                # LeakyReLU(0.1)
    r += (L + 1) * HP
    h = jnp.maximum(jnp.dot(h, wp_ref[pl.ds(r, HP), pl.ds(0, outp)],
                            preferred_element_type=jnp.float32) + bias(2 * L + 2, outp), 0.0)
    r += HP
    h = jnp.maximum(jnp.dot(h, wp_ref[pl.ds(r, outp), pl.ds(0, 256)],
                            preferred_element_type=jnp.float32) + bias(2 * L + 3, 256), 0.0)
    r += outp
    o_ref[...] = jnp.dot(h, wp_ref[pl.ds(r, 256), pl.ds(0, HP)],
                         preferred_element_type=jnp.float32) + bias(2 * L + 4, HP)


# --------------------------------------------------------------------------- wrapper
def skip_last_gnn_forward(params, x, adj, pool_mat, *, n_layers, eps=0.0):
    """SkipLastGNN.forward (GIN convs, learnable skip, eval mode) as one fused Pallas kernel."""
    N, input_dim = x.shape
    H = params["pre_w"].shape[1]
    G = pool_mat.shape[0]
    L = n_layers

    HP = _round_up(H, 128)                 # lane-dense feature width
    OUT = params["post"][2].shape[1]
    OUTP = _round_up(OUT, 128)
    FINAL = params["post"][6].shape[1]     # == hidden_dim
    NP = _round_up(N, 8)                   # sublane-aligned node count
    IDP = _round_up(input_dim, 128)
    PMAX = max(HP, OUTP, 256)

    # Zero-padding is exact: padded weight rows/cols and biases are zero, padded adjacency /
    # pooling COLUMNS are zero, so padded node rows / lanes never contribute to real outputs.
    xp = _pad2(x, NP, IDP)
    adjp = _pad2(adj, NP, NP)
    poolp = _pad2(pool_mat, G, NP)

    # ---- slab 1: every HP-wide weight (pre_mp, all conv w1/w2), stacked along rows ----
    wh_blocks = [_pad2(params["pre_w"], IDP, HP)]
    for i in range(L):
        w1, _, w2, _ = params["convs"][i]
        # fold the learnable-skip gate into w1: diag(repeat(sigmoid(skip), H)) @ w1
        sig = jax.nn.sigmoid(params["learnable_skip"][i, :i + 1]).astype(jnp.float32)
        w1s = w1 * jnp.repeat(sig, H)[:, None]
        wh_blocks.append(_block_pad_rows(w1s, H, HP, HP))     # [(i+1)*HP, HP]
        wh_blocks.append(_pad2(w2, HP, HP))                   # [HP, HP]
    wh = jnp.concatenate(wh_blocks, axis=0)

    # ---- slab 2: post_mp weights, columns padded to PMAX ----
    pw1, pb1, pw2, pb2, pw3, pb3, pw4, pb4 = params["post"]
    wp = jnp.concatenate([
        _pad2(_block_pad_rows(pw1, H, HP, HP), (L + 1) * HP, PMAX),
        _pad2(pw2, HP, PMAX),
        _pad2(pw3, OUTP, PMAX),
        _pad2(pw4, 256, PMAX),
    ], axis=0)

    # ---- slab 3: every bias as one sublane-aligned 8-row block, columns padded to PMAX ----
    biases = [params["pre_b"]]
    for i in range(L):
        _, b1, _, b2 = params["convs"][i]
        biases += [b1, b2]
    biases += [pb1, pb2, pb3, pb4]
    bslab = jnp.concatenate([_pad2(b, _BIAS_ROWS, PMAX) for b in biases], axis=0)

    args = [xp, adjp, poolp, wh, wp, bslab]

    # Advisory cost estimate so XLA schedules surrounding ops sensibly around the fused call.
    flops = 2 * NP * IDP * HP                                   # pre_mp
    flops += L * 2 * NP * NP * HP                               # adjacency aggregations
    flops += sum(2 * NP * (i + 1) * HP * HP + 2 * NP * HP * HP for i in range(L))  # GIN MLPs
    flops += 2 * G * NP * (L + 1) * HP                          # global_add_pool
    flops += 2 * G * ((L + 1) * HP * HP + HP * OUTP + OUTP * 256 + 256 * HP)       # post_mp
    bytes_accessed = sum(int(a.size) * a.dtype.itemsize for a in args) + G * HP * 4

    kernel = functools.partial(_fused_kernel, n_layers=L, hp=HP, idp=IDP, outp=OUTP, eps=eps)

    out = pl.pallas_call(
        kernel,
        out_shape=jax.ShapeDtypeStruct((G, HP), jnp.float32),
        # No grid: a single invocation with whole-array, SINGLE-buffered VMEM residents
        # (grid=(1,) with default BlockSpecs would double-buffer every input for nothing).
        in_specs=[pl.BlockSpec(memory_space=pltpu.MemorySpace.VMEM)] * len(args),
        out_specs=pl.BlockSpec(memory_space=pltpu.MemorySpace.VMEM),
        scratch_shapes=[
            pltpu.VMEM((NP, L * HP), jnp.float32),        # cached GIN pre-activations per block
            pltpu.VMEM((NP, (L + 1) * HP), jnp.float32),  # concat(x_0..x_L) for the pooled matmul
        ],
        compiler_params=pltpu.CompilerParams(vmem_limit_bytes=_pick_vmem_limit()),
        cost_estimate=pl.CostEstimate(flops=int(flops), transcendentals=0,
                                      bytes_accessed=int(bytes_accessed)),
    )(*args)
    return out[:, :FINAL]


# --------------------------------------------------------------------------- reference (pure JAX)
def reference_forward(params, x0, adj, pool_mat, n_layers, eps=0.0):
    x = x0 @ params["pre_w"] + params["pre_b"]
    emb = x
    all_emb = x[:, None, :]
    for i in range(n_layers):
        sig = jax.nn.sigmoid(params["learnable_skip"][i, :i + 1])[None, :, None]
        curr = (all_emb * sig).reshape(x.shape[0], -1)
        w1, b1, w2, b2 = params["convs"][i]
        h = (1.0 + eps) * curr + adj @ curr
        h = jnp.maximum(h @ w1 + b1, 0.0)
        x = jnp.maximum(h @ w2 + b2, 0.0)
        emb = jnp.concatenate([emb, x], axis=1)
        all_emb = jnp.concatenate([all_emb, x[:, None, :]], axis=1)
    pooled = pool_mat @ emb
    w1, b1, w2, b2, w3, b3, w4, b4 = params["post"]
    h = pooled @ w1 + b1
    h = jnp.where(h > 0, h, 0.1 * h)
    h = jnp.maximum(h @ w2 + b2, 0.0)
    h = jnp.maximum(h @ w3 + b3, 0.0)
    return h @ w4 + b4


# --------------------------------------------------------------------------- setup
def init_params(key, input_dim, hidden_dim, output_dim, n_layers):
    keys = iter(jax.random.split(key, 64))

    def w(shape, s=0.1):
        return (s * jax.random.normal(next(keys), shape)).astype(jnp.float32)

    params = {
        "pre_w": w((input_dim, hidden_dim)),
        "pre_b": w((1, hidden_dim), 0.01),
        # torch init: nn.Parameter(torch.ones(n_layers, n_layers))
        "learnable_skip": jnp.ones((n_layers, n_layers), jnp.float32),
        "convs": [],
    }
    for l in range(n_layers):
        din = hidden_dim * (l + 1)  # skip == 'learnable' -> growing input dim
        params["convs"].append(
            (w((din, hidden_dim)), w((1, hidden_dim), 0.01),
             w((hidden_dim, hidden_dim)), w((1, hidden_dim), 0.01))
        )
    post_in = hidden_dim * (n_layers + 1)
    # NOTE: post_mp only type-checks in the original module when output_dim == hidden_dim.
    params["post"] = (
        w((post_in, hidden_dim)), w((1, hidden_dim), 0.01),
        w((hidden_dim, output_dim)), w((1, output_dim), 0.01),
        w((output_dim, 256)), w((1, 256), 0.01),
        w((256, hidden_dim)), w((1, hidden_dim), 0.01),
    )
    return params


if __name__ == "__main__":
    N, INPUT_DIM, HIDDEN, N_LAYERS, NUM_GRAPHS = 32, 16, 32, 3, 2
    OUTPUT_DIM = HIDDEN  # required for the original post_mp Sequential to be shape-consistent

    key = jax.random.PRNGKey(0)
    k_x, k_adj, k_p = jax.random.split(key, 3)

    x = jax.random.normal(k_x, (N, INPUT_DIM), dtype=jnp.float32)

    # random directed edges, self loops removed (remove_self_loops); A[i, j] = 1 iff edge j -> i
    adj = (jax.random.uniform(k_adj, (N, N)) < 0.15).astype(jnp.float32)
    adj = adj * (1.0 - jnp.eye(N, dtype=jnp.float32))

    # batch vector: first half nodes -> graph 0, second half -> graph 1
    batch = jnp.concatenate([jnp.zeros(N // 2, jnp.int32), jnp.ones(N - N // 2, jnp.int32)])
    pool_mat = jax.nn.one_hot(batch, NUM_GRAPHS, dtype=jnp.float32).T  # [G, N]

    params = init_params(k_p, INPUT_DIM, HIDDEN, OUTPUT_DIM, N_LAYERS)

    # TODO(synk): training-mode dropout and the non-GIN conv variants (GCN/SAGE/GAT/gated/PNA)
    # plus the feature_preprocess branch are not implemented (eval-mode GIN path only).
    out = skip_last_gnn_forward(params, x, adj, pool_mat, n_layers=N_LAYERS, eps=0.0)
    out = jax.block_until_ready(out)

    ref = reference_forward(params, x, adj, pool_mat, N_LAYERS, eps=0.0)
    assert out.shape == (NUM_GRAPHS, HIDDEN)
    assert jnp.allclose(out, ref, rtol=1e-4, atol=1e-4), "mismatch vs pure-JAX reference"

    print("KERNEL_OK")
</pallas_src>

<mosaic_0001>
module attributes {stable_mosaic.version = 11 : i64} {
  func.func @_fused_kernel(%arg0: memref<32x128xf32, #tpu.memory_space<vmem>>, %arg1: memref<32x32xf32, #tpu.memory_space<vmem>>, %arg2: memref<2x32xf32, #tpu.memory_space<vmem>>, %arg3: memref<1280x128xf32, #tpu.memory_space<vmem>>, %arg4: memref<1024x256xf32, #tpu.memory_space<vmem>>, %arg5: memref<88x256xf32, #tpu.memory_space<vmem>>, %arg6: memref<2x128xf32, #tpu.memory_space<vmem>>, %arg7: memref<32x384xf32, #tpu.memory_space<vmem>>, %arg8: memref<32x512xf32, #tpu.memory_space<vmem>>) attributes {dimension_semantics = [], scalar_prefetch = 0 : i64, scratch_operands = 2 : i64, tpu.core_type = #tpu.core_type<tc>} {
    %c0 = arith.constant 0 : index
    %c0_0 = arith.constant 0 : index
    %0 = vector.load %arg0[%c0, %c0_0] : memref<32x128xf32, #tpu.memory_space<vmem>>, vector<32x128xf32>
    %c0_1 = arith.constant 0 : index
    %c0_2 = arith.constant 0 : index
    %1 = vector.load %arg3[%c0_1, %c0_2] : memref<1280x128xf32, #tpu.memory_space<vmem>>, vector<128x128xf32>
    %cst = arith.constant dense<0.000000e+00> : vector<32x128xf32>
    %2 = tpu.matmul %0, %1, %cst {dimension_numbers = #tpu.dot_dimension_numbers<[1], [0], [0], [1], [0, 0, 1, 1], [], []>} : vector<32x128xf32>, vector<128x128xf32>, vector<32x128xf32> -> vector<32x128xf32>
    %c0_3 = arith.constant 0 : index
    %c0_4 = arith.constant 0 : index
    %3 = vector.load %arg5[%c0_3, %c0_4] : memref<88x256xf32, #tpu.memory_space<vmem>>, vector<1x128xf32>
    %4 = vector.broadcast %3 : vector<1x128xf32> to vector<32x128xf32>
    %5 = arith.addf %2, %4 : vector<32x128xf32>
    %c0_5 = arith.constant 0 : index
    %c0_6 = arith.constant 0 : index
    %6 = vector.load %arg8[%c0_5, %c0_6] : memref<32x512xf32, #tpu.memory_space<vmem>>, vector<32x128xf32>
    tpu.vector_store %arg8[%c0_5, %c0_6], %5 {strides = array<i32>} : memref<32x512xf32, #tpu.memory_space<vmem>>, vector<32x128xf32>,
    %c0_7 = arith.constant 0 : index
    %c0_8 = arith.constant 0 : index
    %7 = vector.load %arg1[%c0_7, %c0_8] : memref<32x32xf32, #tpu.memory_space<vmem>>, vector<32x32xf32>
    %cst_9 = arith.constant dense<0.000000e+00> : vector<32x128xf32>
    %8 = tpu.matmul %7, %5, %cst_9 {dimension_numbers = #tpu.dot_dimension_numbers<[1], [0], [0], [1], [0, 0, 1, 1], [], []>} : vector<32x32xf32>, vector<32x128xf32>, vector<32x128xf32> -> vector<32x128xf32>
    %9 = arith.addf %5, %8 : vector<32x128xf32>
    %c0_10 = arith.constant 0 : index
    %c0_11 = arith.constant 0 : index
    %10 = vector.load %arg7[%c0_10, %c0_11] : memref<32x384xf32, #tpu.memory_space<vmem>>, vector<32x128xf32>
    tpu.vector_store %arg7[%c0_10, %c0_11], %9 {strides = array<i32>} : memref<32x384xf32, #tpu.memory_space<vmem>>, vector<32x128xf32>,
    %c0_12 = arith.constant 0 : index
    %c0_13 = arith.constant 0 : index
    %11 = vector.load %arg7[%c0_12, %c0_13] : memref<32x384xf32, #tpu.memory_space<vmem>>, vector<32x128xf32>
    %c128 = arith.constant 128 : index
    %c0_14 = arith.constant 0 : index
    %12 = vector.load %arg3[%c128, %c0_14] : memref<1280x128xf32, #tpu.memory_space<vmem>>, vector<128x128xf32>
    %cst_15 = arith.constant dense<0.000000e+00> : vector<32x128xf32>
    %13 = tpu.matmul %11, %12, %cst_15 {dimension_numbers = #tpu.dot_dimension_numbers<[1], [0], [0], [1], [0, 0, 1, 1], [], []>} : vector<32x128xf32>, vector<128x128xf32>, vector<32x128xf32> -> vector<32x128xf32>
    %c8 = arith.constant 8 : index
    %c0_16 = arith.constant 0 : index
    %14 = vector.load %arg5[%c8, %c0_16] : memref<88x256xf32, #tpu.memory_space<vmem>>, vector<1x128xf32>
    %15 = vector.broadcast %14 : vector<1x128xf32> to vector<32x128xf32>
    %16 = arith.addf %13, %15 : vector<32x128xf32>
    %cst_17 = arith.constant 0.000000e+00 : f32
    %17 = vector.broadcast %cst_17 : f32 to vector<32x128xf32>
    %18 = arith.maximumf %16, %17 : vector<32x128xf32>
    %c256 = arith.constant 256 : index
    %c0_18 = arith.constant 0 : index
    %19 = vector.load %arg3[%c256, %c0_18] : memref<1280x128xf32, #tpu.memory_space<vmem>>, vector<128x128xf32>
    %cst_19 = arith.constant dense<0.000000e+00> : vector<32x128xf32>
    %20 = tpu.matmul %18, %19, %cst_19 {dimension_numbers = #tpu.dot_dimension_numbers<[1], [0], [0], [1], [0, 0, 1, 1], [], []>} : vector<32x128xf32>, vector<128x128xf32>, vector<32x128xf32> -> vector<32x128xf32>
    %c16 = arith.constant 16 : index
    %c0_20 = arith.constant 0 : index
    %21 = vector.load %arg5[%c16, %c0_20] : memref<88x256xf32, #tpu.memory_space<vmem>>, vector<1x128xf32>
    %22 = vector.broadcast %21 : vector<1x128xf32> to vector<32x128xf32>
    %23 = arith.addf %20, %22 : vector<32x128xf32>
    %cst_21 = arith.constant 0.000000e+00 : f32
    %24 = vector.broadcast %cst_21 : f32 to vector<32x128xf32>
    %25 = arith.maximumf %23, %24 : vector<32x128xf32>
    %c0_22 = arith.constant 0 : index
    %c128_23 = arith.constant 128 : index
    %26 = vector.load %arg8[%c0_22, %c128_23] : memref<32x512xf32, #tpu.memory_space<vmem>>, vector<32x128xf32>
    tpu.vector_store %arg8[%c0_22, %c128_23], %25 {strides = array<i32>} : memref<32x512xf32, #tpu.memory_space<vmem>>, vector<32x128xf32>,
    %c0_24 = arith.constant 0 : index
    %c0_25 = arith.constant 0 : index
    %27 = vector.load %arg1[%c0_24, %c0_25] : memref<32x32xf32, #tpu.memory_space<vmem>>, vector<32x32xf32>
    %cst_26 = arith.constant dense<0.000000e+00> : vector<32x128xf32>
    %28 = tpu.matmul %27, %25, %cst_26 {dimension_numbers = #tpu.dot_dimension_numbers<[1], [0], [0], [1], [0, 0, 1, 1], [], []>} : vector<32x32xf32>, vector<32x128xf32>, vector<32x128xf32> -> vector<32x128xf32>
    %29 = arith.addf %25, %28 : vector<32x128xf32>
    %c0_27 = arith.constant 0 : index
    %c128_28 = arith.constant 128 : index
    %30 = vector.load %arg7[%c0_27, %c128_28] : memref<32x384xf32, #tpu.memory_space<vmem>>, vector<32x128xf32>
    tpu.vector_store %arg7[%c0_27, %c128_28], %29 {strides = array<i32>} : memref<32x384xf32, #tpu.memory_space<vmem>>, vector<32x128xf32>,
    %c0_29 = arith.constant 0 : index
    %c0_30 = arith.constant 0 : index
    %31 = vector.load %arg7[%c0_29, %c0_30] : memref<32x384xf32, #tpu.memory_space<vmem>>, vector<32x128xf32>
    %c384 = arith.constant 384 : index
    %c0_31 = arith.constant 0 : index
    %32 = vector.load %arg3[%c384, %c0_31] : memref<1280x128xf32, #tpu.memory_space<vmem>>, vector<128x128xf32>
    %cst_32 = arith.constant dense<0.000000e+00> : vector<32x128xf32>
    %33 = tpu.matmul %31, %32, %cst_32 {dimension_numbers = #tpu.dot_dimension_numbers<[1], [0], [0], [1], [0, 0, 1, 1], [], []>} : vector<32x128xf32>, vector<128x128xf32>, vector<32x128xf32> -> vector<32x128xf32>
    %c0_33 = arith.constant 0 : index
    %c128_34 = arith.constant 128 : index
    %34 = vector.load %arg7[%c0_33, %c128_34] : memref<32x384xf32, #tpu.memory_space<vmem>>, vector<32x128xf32>
    %c512 = arith.constant 512 : index
    %c0_35 = arith.constant 0 : index
    %35 = vector.load %arg3[%c512, %c0_35] : memref<1280x128xf32, #tpu.memory_space<vmem>>, vector<128x128xf32>
    %cst_36 = arith.constant dense<0.000000e+00> : vector<32x128xf32>
    %36 = tpu.matmul %34, %35, %cst_36 {dimension_numbers = #tpu.dot_dimension_numbers<[1], [0], [0], [1], [0, 0, 1, 1], [], []>} : vector<32x128xf32>, vector<128x128xf32>, vector<32x128xf32> -> vector<32x128xf32>
    %37 = arith.addf %33, %36 : vector<32x128xf32>
    %c24 = arith.constant 24 : index
    %c0_37 = arith.constant 0 : index
    %38 = vector.load %arg5[%c24, %c0_37] : memref<88x256xf32, #tpu.memory_space<vmem>>, vector<1x128xf32>
    %39 = vector.broadcast %38 : vector<1x128xf32> to vector<32x128xf32>
    %40 = arith.addf %37, %39 : vector<32x128xf32>
    %cst_38 = arith.constant 0.000000e+00 : f32
    %41 = vector.broadcast %cst_38 : f32 to vector<32x128xf32>
    %42 = arith.maximumf %40, %41 : vector<32x128xf32>
    %c640 = arith.constant 640 : index
    %c0_39 = arith.constant 0 : index
    %43 = vector.load %arg3[%c640, %c0_39] : memref<1280x128xf32, #tpu.memory_space<vmem>>, vector<128x128xf32>
    %cst_40 = arith.constant dense<0.000000e+00> : vector<32x128xf32>
    %44 = tpu.matmul %42, %43, %cst_40 {dimension_numbers = #tpu.dot_dimension_numbers<[1], [0], [0], [1], [0, 0, 1, 1], [], []>} : vector<32x128xf32>, vector<128x128xf32>, vector<32x128xf32> -> vector<32x128xf32>
    %c32 = arith.constant 32 : index
    %c0_41 = arith.constant 0 : index
    %45 = vector.load %arg5[%c32, %c0_41] : memref<88x256xf32, #tpu.memory_space<vmem>>, vector<1x128xf32>
    %46 = vector.broadcast %45 : vector<1x128xf32> to vector<32x128xf32>
    %47 = arith.addf %44, %46 : vector<32x128xf32>
    %cst_42 = arith.constant 0.000000e+00 : f32
    %48 = vector.broadcast %cst_42 : f32 to vector<32x128xf32>
    %49 = arith.maximumf %47, %48 : vector<32x128xf32>
    %c0_43 = arith.constant 0 : index
    %c256_44 = arith.constant 256 : index
    %50 = vector.load %arg8[%c0_43, %c256_44] : memref<32x512xf32, #tpu.memory_space<vmem>>, vector<32x128xf32>
    tpu.vector_store %arg8[%c0_43, %c256_44], %49 {strides = array<i32>} : memref<32x512xf32, #tpu.memory_space<vmem>>, vector<32x128xf32>,
    %c0_45 = arith.constant 0 : index
    %c0_46 = arith.constant 0 : index
    %51 = vector.load %arg1[%c0_45, %c0_46] : memref<32x32xf32, #tpu.memory_space<vmem>>, vector<32x32xf32>
    %cst_47 = arith.constant dense<0.000000e+00> : vector<32x128xf32>
    %52 = tpu.matmul %51, %49, %cst_47 {dimension_numbers = #tpu.dot_dimension_numbers<[1], [0], [0], [1], [0, 0, 1, 1], [], []>} : vector<32x32xf32>, vector<32x128xf32>, vector<32x128xf32> -> vector<32x128xf32>
    %53 = arith.addf %49, %52 : vector<32x128xf32>
    %c0_48 = arith.constant 0 : index
    %c256_49 = arith.constant 256 : index
    %54 = vector.load %arg7[%c0_48, %c256_49] : memref<32x384xf32, #tpu.memory_space<vmem>>, vector<32x128xf32>
    tpu.vector_store %arg7[%c0_48, %c256_49], %53 {strides = array<i32>} : memref<32x384xf32, #tpu.memory_space<vmem>>, vector<32x128xf32>,
    %c0_50 = arith.constant 0 : index
    %c0_51 = arith.constant 0 : index
    %55 = vector.load %arg7[%c0_50, %c0_51] : memref<32x384xf32, #tpu.memory_space<vmem>>, vector<32x128xf32>
    %c768 = arith.constant 768 : index
    %c0_52 = arith.constant 0 : index
    %56 = vector.load %arg3[%c768, %c0_52] : memref<1280x128xf32, #tpu.memory_space<vmem>>, vector<128x128xf32>
    %cst_53 = arith.constant dense<0.000000e+00> : vector<32x128xf32>
    %57 = tpu.matmul %55, %56, %cst_53 {dimension_numbers = #tpu.dot_dimension_numbers<[1], [0], [0], [1], [0, 0, 1, 1], [], []>} : vector<32x128xf32>, vector<128x128xf32>, vector<32x128xf32> -> vector<32x128xf32>
    %c0_54 = arith.constant 0 : index
    %c128_55 = arith.constant 128 : index
    %58 = vector.load %arg7[%c0_54, %c128_55] : memref<32x384xf32, #tpu.memory_space<vmem>>, vector<32x128xf32>
    %c896 = arith.constant 896 : index
    %c0_56 = arith.constant 0 : index
    %59 = vector.load %arg3[%c896, %c0_56] : memref<1280x128xf32, #tpu.memory_space<vmem>>, vector<128x128xf32>
    %cst_57 = arith.constant dense<0.000000e+00> : vector<32x128xf32>
    %60 = tpu.matmul %58, %59, %cst_57 {dimension_numbers = #tpu.dot_dimension_numbers<[1], [0], [0], [1], [0, 0, 1, 1], [], []>} : vector<32x128xf32>, vector<128x128xf32>, vector<32x128xf32> -> vector<32x128xf32>
    %61 = arith.addf %57, %60 : vector<32x128xf32>
    %c0_58 = arith.constant 0 : index
    %c256_59 = arith.constant 256 : index
    %62 = vector.load %arg7[%c0_58, %c256_59] : memref<32x384xf32, #tpu.memory_space<vmem>>, vector<32x128xf32>
    %c1024 = arith.constant 1024 : index
    %c0_60 = arith.constant 0 : index
    %63 = vector.load %arg3[%c1024, %c0_60] : memref<1280x128xf32, #tpu.memory_space<vmem>>, vector<128x128xf32>
    %cst_61 = arith.constant dense<0.000000e+00> : vector<32x128xf32>
    %64 = tpu.matmul %62, %63, %cst_61 {dimension_numbers = #tpu.dot_dimension_numbers<[1], [0], [0], [1], [0, 0, 1, 1], [], []>} : vector<32x128xf32>, vector<128x128xf32>, vector<32x128xf32> -> vector<32x128xf32>
    %65 = arith.addf %61, %64 : vector<32x128xf32>
    %c40 = arith.constant 40 : index
    %c0_62 = arith.constant 0 : index
    %66 = vector.load %arg5[%c40, %c0_62] : memref<88x256xf32, #tpu.memory_space<vmem>>, vector<1x128xf32>
    %67 = vector.broadcast %66 : vector<1x128xf32> to vector<32x128xf32>
    %68 = arith.addf %65, %67 : vector<32x128xf32>
    %cst_63 = arith.constant 0.000000e+00 : f32
    %69 = vector.broadcast %cst_63 : f32 to vector<32x128xf32>
    %70 = arith.maximumf %68, %69 : vector<32x128xf32>
    %c1152 = arith.constant 1152 : index
    %c0_64 = arith.constant 0 : index
    %71 = vector.load %arg3[%c1152, %c0_64] : memref<1280x128xf32, #tpu.memory_space<vmem>>, vector<128x128xf32>
    %cst_65 = arith.constant dense<0.000000e+00> : vector<32x128xf32>
    %72 = tpu.matmul %70, %71, %cst_65 {dimension_numbers = #tpu.dot_dimension_numbers<[1], [0], [0], [1], [0, 0, 1, 1], [], []>} : vector<32x128xf32>, vector<128x128xf32>, vector<32x128xf32> -> vector<32x128xf32>
    %c48 = arith.constant 48 : index
    %c0_66 = arith.constant 0 : index
    %73 = vector.load %arg5[%c48, %c0_66] : memref<88x256xf32, #tpu.memory_space<vmem>>, vector<1x128xf32>
    %74 = vector.broadcast %73 : vector<1x128xf32> to vector<32x128xf32>
    %75 = arith.addf %72, %74 : vector<32x128xf32>
    %cst_67 = arith.constant 0.000000e+00 : f32
    %76 = vector.broadcast %cst_67 : f32 to vector<32x128xf32>
    %77 = arith.maximumf %75, %76 : vector<32x128xf32>
    %c0_68 = arith.constant 0 : index
    %c384_69 = arith.constant 384 : index
    %78 = vector.load %arg8[%c0_68, %c384_69] : memref<32x512xf32, #tpu.memory_space<vmem>>, vector<32x128xf32>
    tpu.vector_store %arg8[%c0_68, %c384_69], %77 {strides = array<i32>} : memref<32x512xf32, #tpu.memory_space<vmem>>, vector<32x128xf32>,
    %c0_70 = arith.constant 0 : index
    %c0_71 = arith.constant 0 : index
    %79 = vector.load %arg2[%c0_70, %c0_71] : memref<2x32xf32, #tpu.memory_space<vmem>>, vector<2x32xf32>
    %c0_72 = arith.constant 0 : index
    %c0_73 = arith.constant 0 : index
    %80 = vector.load %arg8[%c0_72, %c0_73] : memref<32x512xf32, #tpu.memory_space<vmem>>, vector<32x512xf32>
    %cst_74 = arith.constant dense<0.000000e+00> : vector<2x512xf32>
    %81 = tpu.matmul %79, %80, %cst_74 {dimension_numbers = #tpu.dot_dimension_numbers<[1], [0], [0], [1], [0, 0, 1, 1], [], []>} : vector<2x32xf32>, vector<32x512xf32>, vector<2x512xf32> -> vector<2x512xf32>
    %c0_75 = arith.constant 0 : index
    %c0_76 = arith.constant 0 : index
    %82 = vector.load %arg4[%c0_75, %c0_76] : memref<1024x256xf32, #tpu.memory_space<vmem>>, vector<512x128xf32>
    %cst_77 = arith.constant dense<0.000000e+00> : vector<2x128xf32>
    %83 = tpu.matmul %81, %82, %cst_77 {dimension_numbers = #tpu.dot_dimension_numbers<[1], [0], [0], [1], [0, 0, 1, 1], [], []>} : vector<2x512xf32>, vector<512x128xf32>, vector<2x128xf32> -> vector<2x128xf32>
    %c56 = arith.constant 56 : index
    %c0_78 = arith.constant 0 : index
    %84 = vector.load %arg5[%c56, %c0_78] : memref<88x256xf32, #tpu.memory_space<vmem>>, vector<1x128xf32>
    %85 = vector.broadcast %84 : vector<1x128xf32> to vector<2x128xf32>
    %86 = arith.addf %83, %85 : vector<2x128xf32>
    %cst_79 = arith.constant 0.000000e+00 : f32
    %87 = vector.broadcast %cst_79 : f32 to vector<2x128xf32>
    %88 = arith.cmpf ogt, %86, %87 : vector<2x128xf32>
    %cst_80 = arith.constant 1.000000e-01 : f32
    %89 = vector.broadcast %cst_80 : f32 to vector<2x128xf32>
    %90 = arith.mulf %89, %86 : vector<2x128xf32>
    %91 = arith.select %88, %86, %90 : vector<2x128xi1>, vector<2x128xf32>
    %c512_81 = arith.constant 512 : index
    %c0_82 = arith.constant 0 : index
    %92 = vector.load %arg4[%c512_81, %c0_82] : memref<1024x256xf32, #tpu.memory_space<vmem>>, vector<128x128xf32>
    %cst_83 = arith.constant dense<0.000000e+00> : vector<2x128xf32>
    %93 = tpu.matmul %91, %92, %cst_83 {dimension_numbers = #tpu.dot_dimension_numbers<[1], [0], [0], [1], [0, 0, 1, 1], [], []>} : vector<2x128xf32>, vector<128x128xf32>, vector<2x128xf32> -> vector<2x128xf32>
    %c64 = arith.constant 64 : index
    %c0_84 = arith.constant 0 : index
    %94 = vector.load %arg5[%c64, %c0_84] : memref<88x256xf32, #tpu.memory_space<vmem>>, vector<1x128xf32>
    %95 = vector.broadcast %94 : vector<1x128xf32> to vector<2x128xf32>
    %96 = arith.addf %93, %95 : vector<2x128xf32>
    %cst_85 = arith.constant 0.000000e+00 : f32
    %97 = vector.broadcast %cst_85 : f32 to vector<2x128xf32>
    %98 = arith.maximumf %96, %97 : vector<2x128xf32>
    %c640_86 = arith.constant 640 : index
    %c0_87 = arith.constant 0 : index
    %99 = vector.load %arg4[%c640_86, %c0_87] : memref<1024x256xf32, #tpu.memory_space<vmem>>, vector<128x256xf32>
    %cst_88 = arith.constant dense<0.000000e+00> : vector<2x256xf32>
    %100 = tpu.matmul %98, %99, %cst_88 {dimension_numbers = #tpu.dot_dimension_numbers<[1], [0], [0], [1], [0, 0, 1, 1], [], []>} : vector<2x128xf32>, vector<128x256xf32>, vector<2x256xf32> -> vector<2x256xf32>
    %c72 = arith.constant 72 : index
    %c0_89 = arith.constant 0 : index
    %101 = vector.load %arg5[%c72, %c0_89] : memref<88x256xf32, #tpu.memory_space<vmem>>, vector<1x256xf32>
    %102 = vector.broadcast %101 : vector<1x256xf32> to vector<2x256xf32>
    %103 = arith.addf %100, %102 : vector<2x256xf32>
    %cst_90 = arith.constant 0.000000e+00 : f32
    %104 = vector.broadcast %cst_90 : f32 to vector<2x256xf32>
    %105 = arith.maximumf %103, %104 : vector<2x256xf32>
    %c768_91 = arith.constant 768 : index
    %c0_92 = arith.constant 0 : index
    %106 = vector.load %arg4[%c768_91, %c0_92] : memref<1024x256xf32, #tpu.memory_space<vmem>>, vector<256x128xf32>
    %cst_93 = arith.constant dense<0.000000e+00> : vector<2x128xf32>
    %107 = tpu.matmul %105, %106, %cst_93 {dimension_numbers = #tpu.dot_dimension_numbers<[1], [0], [0], [1], [0, 0, 1, 1], [], []>} : vector<2x256xf32>, vector<256x128xf32>, vector<2x128xf32> -> vector<2x128xf32>
    %c80 = arith.constant 80 : index
    %c0_94 = arith.constant 0 : index
    %108 = vector.load %arg5[%c80, %c0_94] : memref<88x256xf32, #tpu.memory_space<vmem>>, vector<1x128xf32>
    %109 = vector.broadcast %108 : vector<1x128xf32> to vector<2x128xf32>
    %110 = arith.addf %107, %109 : vector<2x128xf32>
    %c0_95 = arith.constant 0 : index
    %c0_96 = arith.constant 0 : index
    %111 = vector.load %arg6[%c0_95, %c0_96] : memref<2x128xf32, #tpu.memory_space<vmem>>, vector<2x128xf32>
    tpu.vector_store %arg6[%c0_95, %c0_96], %110 {strides = array<i32>} : memref<2x128xf32, #tpu.memory_space<vmem>>, vector<2x128xf32>,
    return
  }
}

</mosaic_0001>

<bundles_post_ra>
// kernel: tpu_custom_call.1
= control target key start
LH: loop header
LB: loop body
LE: loop exit
PB: predicated region body
PF: predicated region fallthrough
CT: control target
= control target key end

     0   :  { %11 = vsyncpa [#allocation5], 0  ;;  %s1631_s0 = inlined_call_operand.hbm [shape: f32[32,128], index: 0, kind: input, shape index: {}]   ;;  %s1632_s1 = inlined_call_operand.hbm [shape: f32[32,32], index: 1, kind: input, shape index: {}]   ;;  %s1633_s2 = inlined_call_operand.hbm [shape: f32[2,32], index: 2, kind: input, shape index: {}]   ;;  %s1634_s3 = inlined_call_operand.hbm [shape: f32[1280,128], index: 3, kind: input, shape index: {}]   ;;  %s1635_s4 = inlined_call_operand.hbm [shape: f32[1024,256], index: 4, kind: input, shape index: {}]   ;;  %s1636_s5 = inlined_call_operand.hbm [shape: f32[88,256], index: 5, kind: input, shape index: {}]   ;;  %s1637_s6 = inlined_call_operand.hbm [shape: f32[2,128], index: 6, kind: output, shape index: {}]  }
   0x1   :  { %12 = vsyncpa [#allocation8], 0 }
   0x2   :  { %13 = vsyncpa [#allocation11], 0 }
   0x3   :  { %14 = vsyncpa [#allocation14], 0 }
   0x4   :  { %15 = vsyncpa [#allocation6], 0  ;;  %s33_s23 = sshll.u32 %s1632_s1, 4  ;;  %s1479_s24 = smov [#allocation7]   ;;  %s34_s23 = int_to_ptr.hbm [resolvable:$true] %s33_s23 }
   0x5   :  { %s35_s25 = sshll.u32 %s1479_s24, 4  ;;  %s57_s28 = sshll.u32 %s1634_s3, 4  ;;  %s36_s25 = int_to_ptr.vmem [resolvable:$true] %s35_s25  ;;  %s58_s28 = int_to_ptr.hbm [resolvable:$true] %s57_s28 }
   0x6   :  { %s1480_s29 = smov 128   ;;  %s1481_s30 = smov 8  }
   0x7   :  { %41 = dma.hbm_to_vmem [thread:$0]  %s34_s23, 512, %s36_s25, [#allocation8], %s1480_s29, %s1480_s29, %s1481_s30  }
   0x8   :  { %s1482_s7 = smov [#allocation10]   ;;  %s20_s11 = sshll.u32 %s1631_s0, 4  ;;  %s21_s11 = int_to_ptr.hbm [resolvable:$true] %s20_s11 }
   0x9   :  { %s59_s8 = sshll.u32 %s1482_s7, 4  ;;  %s47_s13 = sshll.u32 %s1633_s2, 4  ;;  %s60_s8 = int_to_ptr.vmem [resolvable:$true] %s59_s8  ;;  %s48_s13 = int_to_ptr.hbm [resolvable:$true] %s47_s13 }
   0xa   :  { %65 = dma.hbm_to_vmem [thread:$0]  %s58_s28, 20480, %s60_s8, [#allocation11], %s1480_s29, %s1480_s29, %s1481_s30  }
   0xb   :  { %s1483_s14 = smov [#allocation4]   ;;  %s1484_s3 = smov [#allocation9]  }
   0xc   :  { %s22_s15 = sshll.u32 %s1483_s14, 4  ;;  %s49_s16 = sshll.u32 %s1484_s3, 4  ;;  %s23_s15 = int_to_ptr.vmem [resolvable:$true] %s22_s15  ;;  %s50_s16 = int_to_ptr.vmem [resolvable:$true] %s49_s16 }
   0xd   :  { %28 = dma.hbm_to_vmem [thread:$0]  %s21_s11, 512, %s23_s15, [#allocation5], %s1480_s29, %s1480_s29, %s1481_s30  }
   0xe   :  { %s70_s19 = sshll.u32 %s1635_s4, 4  ;;  %s1485_s0 = smov [#allocation12]   ;;  %s71_s19 = int_to_ptr.hbm [resolvable:$true] %s70_s19 }
   0xf   :  { %52 = dma.hbm_to_vmem [thread:$0]  %s48_s13, 32, %s50_s16, [#allocation8]  }
  0x10   :  { %s72_s20 = sshll.u32 %s1485_s0, 4  ;;  %s83_s2 = sshll.u32 %s1636_s5, 4  ;;  %s73_s20 = int_to_ptr.vmem [resolvable:$true] %s72_s20  ;;  %s84_s2 = int_to_ptr.hbm [resolvable:$true] %s83_s2 }
  0x11   :  { %s1486_s23 = smov 256   ;;  %s1487_s24 = smov 16  }
  0x12   :  { %78 = dma.hbm_to_vmem [thread:$0]  %s71_s19, 32768, %s73_s20, [#allocation11], %s1486_s23, %s1486_s23, %s1487_s24  }
  0x13   :  { %s1488_s25 = smov [#allocation13]  }
  0x14   :  { %s85_s26 = sshll.u32 %s1488_s25, 4  ;;  %s86_s26 = int_to_ptr.vmem [resolvable:$true] %s85_s26 }
  0x15   :  { %91 = dma.hbm_to_vmem [thread:$0]  %s84_s2, 2816, %s86_s26, [#allocation14], %s1486_s23, %s1486_s23, %s1487_s24  }
  0x16   :  { %1469 = dma.done.wait [#allocation5], 512  }
  0x17   :  { %1470 = vsyncadd [#allocation5], 4294966784 }
  0x18   :  { %1471 = dma.done.wait [#allocation8], 544  }
  0x19   :  { %1472 = vsyncadd [#allocation8], 4294966752 }
  0x1a   :  { %1473 = dma.done.wait [#allocation11], 53248  }
  0x1b   :  { %1474 = vsyncadd [#allocation11], 4294914048 }
  0x1c   :  { %1475 = dma.done.wait [#allocation14], 2816  }
  0x1d   :  { %1476 = vsyncadd [#allocation14], 4294964480  ;;  %v135_v0 = vld [vmem:[#allocation10 + $0x78] sm:$0xff]  ;;  %v134_v1 = vld [vmem:[#allocation10 + $0x70] sm:$0xff]  ;;  %vm174_vm0 = vcmask 261120   ;;  %s1489_s4 = smov [#allocation15]  }
  0x1e   :  { %137 = vmatpush.msra.mxu0 %v135_v0  ;;  %v133_v2 = vld [vmem:[#allocation10 + $0x68] sm:$0xff]  ;;  %v132_v3 = vld [vmem:[#allocation10 + $0x60] sm:$0xff]  ;;  %v131_v4 = vld [vmem:[#allocation10 + $0x58] sm:$0xff]  ;;  %s1259_s5 = sshll.u32 %s1489_s4, 4  ;;  %s1261_s29 = sshll.u32 %s1637_s6, 4  ;;  %s1260_s5 = int_to_ptr.vmem [resolvable:$true] %s1259_s5  ;;  %s1262_s29 = int_to_ptr.hbm [resolvable:$true] %s1261_s29 }
  0x1f   :  { %v130_v5 = vld [vmem:[#allocation10 + $0x50] sm:$0xff]  ;;  %v129_v6 = vld [vmem:[#allocation10 + $0x48] sm:$0xff]  ;;  %v128_v7 = vld [vmem:[#allocation10 + $0x40] sm:$0xff] }
  0x20   :  { %138 = vmatpush.msra.mxu0 %v134_v1  ;;  %v127_v8 = vld [vmem:[#allocation10 + $0x38] sm:$0xff]  ;;  %v126_v9 = vld [vmem:[#allocation10 + $0x30] sm:$0xff]  ;;  %v125_v10 = vld [vmem:[#allocation10 + $0x28] sm:$0xff] }
  0x21   :  { %v124_v11 = vld [vmem:[#allocation10 + $0x20] sm:$0xff]  ;;  %v123_v12 = vld [vmem:[#allocation10 + $0x18] sm:$0xff]  ;;  %v122_v13 = vld [vmem:[#allocation10 + $0x10] sm:$0xff] }
  0x22   :  { %139 = vmatpush.msra.mxu0 %v133_v2  ;;  %v121_v14 = vld [vmem:[#allocation10 + $0x8] sm:$0xff]  ;;  %v120_v15 = vld [vmem:[#allocation10] sm:$0xff]  ;;  %v119_v19 = vld [vmem:[#allocation4 + $0x18] sm:$0xff] }
  0x23   :  { %v116_v16 = vld [vmem:[#allocation4] sm:$0xff]  ;;  %v117_v17 = vld [vmem:[#allocation4 + $0x8] sm:$0xff]  ;;  %v118_v18 = vld [vmem:[#allocation4 + $0x10] sm:$0xff] }
  0x24   :  { %140 = vmatpush.msra.mxu0 %v132_v3  ;;  %v136_v23 = vld [vmem:[#allocation13] ss:$0 sm:$0xff]  ;;  %v243_v26 = vld [vmem:[#allocation10 + $0xf8] sm:$0xff]  ;;  %v242_v27 = vld [vmem:[#allocation10 + $0xf0] sm:$0xff] }
  0x25   :  { %245 = vmatpush.msra.mxu2 %v243_v26  ;;  %v241_v29 = vld [vmem:[#allocation10 + $0xe8] sm:$0xff]  ;;  %v240_v31 = vld [vmem:[#allocation10 + $0xe0] sm:$0xff]  ;;  %v239_v34 = vld [vmem:[#allocation10 + $0xd8] sm:$0xff] }
  0x26   :  { %141 = vmatpush.msra.mxu0 %v131_v4  ;;  %v1554_v33 = vld [vmem:[#allocation7] sm:$0xff]  ;;  %v238_v35 = vld [vmem:[#allocation10 + $0xd0] sm:$0xff]  ;;  %v237_v36 = vld [vmem:[#allocation10 + $0xc8] sm:$0xff] }
  0x27   :  { %246 = vmatpush.msra.mxu2 %v242_v27  ;;  %v236_v37 = vld [vmem:[#allocation10 + $0xc0] sm:$0xff]  ;;  %v235_v39 = vld [vmem:[#allocation10 + $0xb8] sm:$0xff]  ;;  %v234_v40 = vld [vmem:[#allocation10 + $0xb0] sm:$0xff] }
  0x28   :  { %142 = vmatpush.msra.mxu0 %v130_v5  ;;  %v1559_v38 = vld [vmem:[#allocation7 + $0x8] sm:$0xff]  ;;  %v1563_v43 = vld [vmem:[#allocation7 + $0x10] sm:$0xff]  ;;  %v231_v44 = vld [vmem:[#allocation10 + $0x98] sm:$0xff] }
  0x29   :  { %247 = vmatpush.msra.mxu2 %v241_v29  ;;  %v233_v41 = vld [vmem:[#allocation10 + $0xa8] sm:$0xff]  ;;  %v232_v42 = vld [vmem:[#allocation10 + $0xa0] sm:$0xff]  ;;  %v230_v45 = vld [vmem:[#allocation10 + $0x90] sm:$0xff] }
  0x2a   :  { %143 = vmatpush.msra.mxu0 %v129_v6  ;;  %v1567_v46 = vld [vmem:[#allocation7 + $0x18] sm:$0xff]  ;;  %v229_v47 = vld [vmem:[#allocation10 + $0x88] sm:$0xff]  ;;  %v228_v48 = vld [vmem:[#allocation10 + $0x80] sm:$0xff] }
  0x2b   :  { %248 = vmatpush.msra.mxu2 %v240_v31  ;;  %v404_v49 = vld [vmem:[#allocation10 + $0x1f8] sm:$0xff]  ;;  %v403_v50 = vld [vmem:[#allocation10 + $0x1f0] sm:$0xff]  ;;  %v402_v51 = vld [vmem:[#allocation10 + $0x1e8] sm:$0xff] }
  0x2c   :  { %144 = vmatpush.msra.mxu0 %v128_v7  ;;  %v401_v52 = vld [vmem:[#allocation10 + $0x1e0] sm:$0xff]  ;;  %v400_v53 = vld [vmem:[#allocation10 + $0x1d8] sm:$0xff]  ;;  %v399_v54 = vld [vmem:[#allocation10 + $0x1d0] sm:$0xff] }
  0x2d   :  { %249 = vmatpush.msra.mxu2 %v239_v34  ;;  %v398_v55 = vld [vmem:[#allocation10 + $0x1c8] sm:$0xff]  ;;  %v397_v56 = vld [vmem:[#allocation10 + $0x1c0] sm:$0xff]  ;;  %v396_v57 = vld [vmem:[#allocation10 + $0x1b8] sm:$0xff] }
  0x2e   :  { %145 = vmatpush.msra.mxu0 %v127_v8  ;;  %v395_v58 = vld [vmem:[#allocation10 + $0x1b0] sm:$0xff]  ;;  %v394_v59 = vld [vmem:[#allocation10 + $0x1a8] sm:$0xff]  ;;  %v393_v60 = vld [vmem:[#allocation10 + $0x1a0] sm:$0xff] }
  0x2f   :  { %250 = vmatpush.msra.mxu2 %v238_v35  ;;  %v392_v61 = vld [vmem:[#allocation10 + $0x198] sm:$0xff]  ;;  %v391_v62 = vld [vmem:[#allocation10 + $0x190] sm:$0xff]  ;;  %v390_v63 = vld [vmem:[#allocation10 + $0x188] sm:$0xff] }
  0x30   :  { %146 = vmatpush.msra.mxu0 %v126_v9  ;;  %v389_v0 = vld [vmem:[#allocation10 + $0x180] sm:$0xff]  ;;  %v618_v3 = vld [vmem:[#allocation10 + $0x378] sm:$0xff]  ;;  %v617_v4 = vld [vmem:[#allocation10 + $0x370] sm:$0xff] }
  0x31   :  { %251 = vmatpush.msra.mxu2 %v237_v36  ;;  %v616_v5 = vld [vmem:[#allocation10 + $0x368] sm:$0xff]  ;;  %v615_v6 = vld [vmem:[#allocation10 + $0x360] sm:$0xff]  ;;  %v614_v9 = vld [vmem:[#allocation10 + $0x358] sm:$0xff] }
  0x32   :  { %147 = vmatpush.msra.mxu0 %v125_v10  ;;  %v613_v10 = vld [vmem:[#allocation10 + $0x350] sm:$0xff]  ;;  %v293_v26 = vld [vmem:[#allocation10 + $0x178] sm:$0xff]  ;;  %v291_v29 = vld [vmem:[#allocation10 + $0x168] sm:$0xff] }
  0x33   :  { %252 = vmatpush.msra.mxu2 %v236_v37  ;;  %v292_v27 = vld [vmem:[#allocation10 + $0x170] sm:$0xff]  ;;  %295 = vmatpush.msra.mxu3 %v293_v26  ;;  %v290_v31 = vld [vmem:[#allocation10 + $0x160] sm:$0xff]  ;;  %v289_v34 = vld [vmem:[#allocation10 + $0x158] sm:$0xff] }
  0x34   :  { %148 = vmatpush.msra.mxu0 %v124_v11  ;;  %v612_v11 = vld [vmem:[#allocation10 + $0x348] sm:$0xff]  ;;  %v288_v35 = vld [vmem:[#allocation10 + $0x150] sm:$0xff]  ;;  %v286_v37 = vld [vmem:[#allocation10 + $0x140] sm:$0xff] }
  0x35   :  { %253 = vmatpush.msra.mxu2 %v235_v39  ;;  %296 = vmatpush.msra.mxu3 %v292_v27  ;;  %v287_v36 = vld [vmem:[#allocation10 + $0x148] sm:$0xff]  ;;  %v285_v39 = vld [vmem:[#allocation10 + $0x138] sm:$0xff]  ;;  %v409_v27 = vld [vmem:[#allocation10 + $0x200] sm:$0xff] }
  0x36   :  { %149 = vmatpush.msra.mxu0 %v123_v12  ;;  %v611_v12 = vld [vmem:[#allocation10 + $0x340] sm:$0xff]  ;;  %v410_v26 = vld [vmem:[#allocation10 + $0x208] sm:$0xff] }
  0x37   :  { %254 = vmatpush.msra.mxu2 %v234_v40  ;;  %297 = vmatpush.msra.mxu3 %v291_v29  ;;  %v284_v40 = vld [vmem:[#allocation10 + $0x130] sm:$0xff]  ;;  %v638_v29 = vld [vmem:[#allocation10 + $0x3f8] sm:$0xff] }
  0x38   :  { %150 = vmatpush.msra.mxu0 %v122_v13 }
  0x39   :  { %255 = vmatpush.msra.mxu2 %v233_v41  ;;  %298 = vmatpush.msra.mxu3 %v290_v31  ;;  %v283_v41 = vld [vmem:[#allocation10 + $0x128] sm:$0xff]  ;;  %v637_v31 = vld [vmem:[#allocation10 + $0x3f0] sm:$0xff] }
  0x3a   :  { %151 = vmatpush.msra.mxu0 %v121_v14 }
  0x3b   :  { %256 = vmatpush.msra.mxu2 %v232_v42  ;;  %299 = vmatpush.msra.mxu3 %v289_v34  ;;  %v282_v42 = vld [vmem:[#allocation10 + $0x120] sm:$0xff]  ;;  %v636_v34 = vld [vmem:[#allocation10 + $0x3e8] sm:$0xff] }
  0x3c   :  { %152 = vmatpush.msra.mxu0 %v120_v15  ;;  %v610_v15 = vld [vmem:[#allocation10 + $0x338] sm:$0xff] }
  0x3d   :  { %153 = vmatmul.f32.vlgmr.msra.gmra.mxu0 %v116_v16  ;;  %257 = vmatpush.msra.mxu2 %v231_v44  ;;  %v609_v16 = vld [vmem:[#allocation10 + $0x330] sm:$0xff]  ;;  %v281_v44 = vld [vmem:[#allocation10 + $0x118] sm:$0xff] }
  0x3e   :  { %300 = vmatpush.msra.mxu3 %v288_v35  ;;  %v635_v35 = vld [vmem:[#allocation10 + $0x3e0] sm:$0xff] }
  0x3f   :  { %258 = vmatpush.msra.mxu2 %v230_v45  ;;  %v280_v45 = vld [vmem:[#allocation10 + $0x110] sm:$0xff] }
  0x40   :  { %301 = vmatpush.msra.mxu3 %v287_v36  ;;  %v634_v36 = vld [vmem:[#allocation10 + $0x3d8] sm:$0xff] }
  0x41   :  { %259 = vmatpush.msra.mxu2 %v229_v47  ;;  %v279_v47 = vld [vmem:[#allocation10 + $0x108] sm:$0xff] }
  0x42   :  { %302 = vmatpush.msra.mxu3 %v286_v37  ;;  %v633_v37 = vld [vmem:[#allocation10 + $0x3d0] sm:$0xff] }
  0x43   :  { %260 = vmatpush.msra.mxu2 %v228_v48  ;;  %v278_v48 = vld [vmem:[#allocation10 + $0x100] sm:$0xff] }
  0x44   :  { %303 = vmatpush.msra.mxu3 %v285_v39  ;;  %v632_v39 = vld [vmem:[#allocation10 + $0x3c8] sm:$0xff] }
  0x45   :  { %156 = vmatmul.f32.gmra.mxu0 %v117_v17  ;;  %454 = vmatpush.msrb.mxu2 %v404_v49  ;;  %v608_v17 = vld [vmem:[#allocation10 + $0x328] sm:$0xff]  ;;  %v244_v49 = vld [vmem:[#allocation13 + $0x10] ss:$0 sm:$0xff] }
  0x46   :  { %304 = vmatpush.msra.mxu3 %v284_v40  ;;  %v631_v40 = vld [vmem:[#allocation10 + $0x3c0] sm:$0xff] }
  0x47   :  { %455 = vmatpush.msrb.mxu2 %v403_v50 }
  0x48   :  { %305 = vmatpush.msra.mxu3 %v283_v41  ;;  %v630_v41 = vld [vmem:[#allocation10 + $0x3b8] sm:$0xff] }
  0x49   :  { %456 = vmatpush.msrb.mxu2 %v402_v51 }
  0x4a   :  { %306 = vmatpush.msra.mxu3 %v282_v42  ;;  %v629_v42 = vld [vmem:[#allocation10 + $0x3b0] sm:$0xff] }
  0x4b   :  { %457 = vmatpush.msrb.mxu2 %v401_v52 }
  0x4c   :  { %307 = vmatpush.msra.mxu3 %v281_v44  ;;  %v628_v44 = vld [vmem:[#allocation10 + $0x3a8] sm:$0xff] }
  0x4d   :  { %159 = vmatmul.f32.gmra.mxu0 %v118_v18  ;;  %458 = vmatpush.msrb.mxu2 %v400_v53  ;;  %v607_v18 = vld [vmem:[#allocation10 + $0x320] sm:$0xff] }
  0x4e   :  { %308 = vmatpush.msra.mxu3 %v280_v45  ;;  %v627_v45 = vld [vmem:[#allocation10 + $0x3a0] sm:$0xff] }
  0x4f   :  { %459 = vmatpush.msrb.mxu2 %v399_v54 }
  0x50   :  { %309 = vmatpush.msra.mxu3 %v279_v47  ;;  %v626_v47 = vld [vmem:[#allocation10 + $0x398] sm:$0xff] }
  0x51   :  { %460 = vmatpush.msrb.mxu2 %v398_v55 }
  0x52   :  { %310 = vmatpush.msra.mxu3 %v278_v48  ;;  %v625_v48 = vld [vmem:[#allocation10 + $0x390] sm:$0xff] }
  0x53   :  { %461 = vmatpush.msrb.mxu2 %v397_v56 }
  0x55   :  { %162 = vmatmul.f32.gmra.mxu0 %v119_v19  ;;  %462 = vmatpush.msrb.mxu2 %v396_v57 }
  0x57   :  { %463 = vmatpush.msrb.mxu2 %v395_v58 }
  0x59   :  { %464 = vmatpush.msrb.mxu2 %v394_v59 }
  0x5b   :  { %465 = vmatpush.msrb.mxu2 %v393_v60 }
  0x5d   :  { %466 = vmatpush.msrb.mxu2 %v392_v61 }
  0x5f   :  { %467 = vmatpush.msrb.mxu2 %v391_v62 }
  0x61   :  { %468 = vmatpush.msrb.mxu2 %v390_v63 }
  0x63   :  { %469 = vmatpush.msrb.mxu2 %v389_v0 }
  0xba   :  { %v154_v20 = vpop.f32.mrf.mxu0 }
  0xbb   :  { %v1551_v32 = vadd.f32 %v154_v20, %v136_v23 }
  0xc2   :  { %v157_v21 = vpop.f32.mrf.mxu0 }
  0xc3   :  { %v1548_v30 = vadd.f32 %v157_v21, %v136_v23  ;;  %v606_v21 = vld [vmem:[#allocation10 + $0x318] sm:$0xff] }
  0xca   :  { %v160_v22 = vpop.f32.mrf.mxu0 }
  0xcb   :  { %v1545_v28 = vadd.f32 %v160_v22, %v136_v23  ;;  %v605_v22 = vld [vmem:[#allocation10 + $0x310] sm:$0xff] }
  0xd2   :  { %v163_v24 = vpop.f32.mrf.mxu0 }
  0xd3   :  { %v1543_v25 = vadd.f32 %v163_v24, %v136_v23  ;;  %v604_v23 = vld [vmem:[#allocation10 + $0x308] sm:$0xff]  ;;  %v603_v24 = vld [vmem:[#allocation10 + $0x300] sm:$0xff] }
  0xd5   :  { %199 = vmatpush.msra.mxu1 %v1543_v25 }
  0xd7   :  { %200 = vmatpush.msra.mxu1 %v1545_v28 }
  0xd9   :  { %201 = vmatpush.msra.mxu1 %v1548_v30 }
  0xdb   :  { %202 = vmatpush.msra.mxu1 %v1551_v32 }
  0xdc   :  { %1274 = vmatmul.msk.f32.vlgmr.msra.gmra.mxu1 %vm174_vm0, %v1554_v33 }
  0xe4   :  { %1275 = vmatmul.msk.f32.gmra.mxu1 %vm174_vm0, %v1559_v38 }
  0xec   :  { %1276 = vmatmul.msk.f32.gmra.mxu1 %vm174_vm0, %v1563_v43 }
  0xf4   :  { %1277 = vmatmul.msk.f32.gmra.mxu1 %vm174_vm0, %v1567_v46 }
 0x159   :  { %v204_v1 = vpop.f32.mrf.mxu1 }
 0x15a   :  { %v216_v2 = vadd.f32 %v204_v1, %v1551_v32  ;;  %v294_v1 = vld [vmem:[#allocation13 + $0x20] ss:$0 sm:$0xff] }
 0x15c   :  { %261 = vmatmul.f32.vlgmr.msra.gmra.mxu2 %v216_v2 }
 0x15d   :  { %668 = vmatpush.msra.mxu2 %v618_v3 }
 0x15f   :  { %669 = vmatpush.msra.mxu2 %v617_v4 }
 0x161   :  { %v207_v7 = vpop.f32.mrf.mxu1  ;;  %670 = vmatpush.msra.mxu2 %v616_v5 }
 0x162   :  { %v217_v8 = vadd.f32 %v207_v7, %v1548_v30  ;;  %v424_v7 = vld [vmem:[#allocation10 + $0x278] sm:$0xff] }
 0x163   :  { %671 = vmatpush.msra.mxu2 %v615_v6  ;;  %425 = vmatpush.msrb.mxu0 %v424_v7 }
 0x164   :  { %264 = vmatmul.f32.gmra.mxu2 %v217_v8 }
 0x165   :  { %672 = vmatpush.msra.mxu2 %v614_v9 }
 0x167   :  { %673 = vmatpush.msra.mxu2 %v613_v10  ;;  %v423_v10 = vld [vmem:[#allocation10 + $0x270] sm:$0xff] }
 0x168   :  { %426 = vmatpush.msrb.mxu0 %v423_v10 }
 0x169   :  { %v210_v13 = vpop.f32.mrf.mxu1  ;;  %674 = vmatpush.msra.mxu2 %v612_v11 }
 0x16a   :  { %v218_v14 = vadd.f32 %v210_v13, %v1545_v28 }
 0x16b   :  { %675 = vmatpush.msra.mxu2 %v611_v12  ;;  %v422_v12 = vld [vmem:[#allocation10 + $0x268] sm:$0xff] }
 0x16c   :  { %267 = vmatmul.f32.gmra.mxu2 %v218_v14  ;;  %427 = vmatpush.msrb.mxu0 %v422_v12 }
 0x16d   :  { %676 = vmatpush.msra.mxu2 %v610_v15  ;;  %v420_v15 = vld [vmem:[#allocation10 + $0x258] sm:$0xff] }
 0x16f   :  { %677 = vmatpush.msra.mxu2 %v609_v16  ;;  %v419_v16 = vld [vmem:[#allocation10 + $0x250] sm:$0xff] }
 0x171   :  { %v213_v19 = vpop.f32.mrf.mxu1  ;;  %678 = vmatpush.msra.mxu2 %v608_v17  ;;  %v418_v17 = vld [vmem:[#allocation10 + $0x248] sm:$0xff] }
 0x172   :  { %v219_v20 = vadd.f32 %v213_v19, %v1543_v25  ;;  %v416_v19 = vld [vmem:[#allocation10 + $0x238] sm:$0xff] }
 0x173   :  { %679 = vmatpush.msra.mxu2 %v607_v18  ;;  %v417_v18 = vld [vmem:[#allocation10 + $0x240] sm:$0xff] }
 0x174   :  { %270 = vmatmul.f32.gmra.mxu2 %v219_v20 }
 0x175   :  { %680 = vmatpush.msra.mxu2 %v606_v21  ;;  %v414_v21 = vld [vmem:[#allocation10 + $0x228] sm:$0xff] }
 0x177   :  { %681 = vmatpush.msra.mxu2 %v605_v22  ;;  %v413_v22 = vld [vmem:[#allocation10 + $0x220] sm:$0xff] }
 0x179   :  { %682 = vmatpush.msra.mxu2 %v604_v23  ;;  %v412_v23 = vld [vmem:[#allocation10 + $0x218] sm:$0xff] }
 0x17b   :  { %683 = vmatpush.msra.mxu2 %v603_v24  ;;  %v411_v24 = vld [vmem:[#allocation10 + $0x210] sm:$0xff] }
 0x17c   :  { %470 = vmatmul.f32.vlgmr.msrb.gmra.mxu2 %v216_v2 }
 0x184   :  { %473 = vmatmul.f32.gmra.mxu2 %v217_v8 }
 0x18c   :  { %476 = vmatmul.f32.gmra.mxu2 %v218_v14 }
 0x194   :  { %479 = vmatmul.f32.gmra.mxu2 %v219_v20 }
 0x19c   :  { %684 = vmatmul.f32.vlgmr.msra.gmra.mxu2 %v216_v2 }
 0x1a4   :  { %687 = vmatmul.f32.gmra.mxu2 %v217_v8 }
 0x1ac   :  { %690 = vmatmul.f32.gmra.mxu2 %v218_v14  ;;  %v421_v14 = vld [vmem:[#allocation10 + $0x260] sm:$0xff] }
 0x1ad   :  { %428 = vmatpush.msrb.mxu0 %v421_v14 }
 0x1af   :  { %429 = vmatpush.msrb.mxu0 %v420_v15 }
 0x1b1   :  { %430 = vmatpush.msrb.mxu0 %v419_v16 }
 0x1b3   :  { %431 = vmatpush.msrb.mxu0 %v418_v17 }
 0x1b4   :  { %693 = vmatmul.f32.gmra.mxu2 %v219_v20  ;;  %v415_v20 = vld [vmem:[#allocation10 + $0x230] sm:$0xff] }
 0x1b5   :  { %432 = vmatpush.msrb.mxu0 %v417_v18 }
 0x1b7   :  { %433 = vmatpush.msrb.mxu0 %v416_v19 }
 0x1b9   :  { %434 = vmatpush.msrb.mxu0 %v415_v20 }
 0x1bb   :  { %435 = vmatpush.msrb.mxu0 %v414_v21 }
 0x1bd   :  { %436 = vmatpush.msrb.mxu0 %v413_v22 }
 0x1bf   :  { %437 = vmatpush.msrb.mxu0 %v412_v23 }
 0x1c1   :  { %438 = vmatpush.msrb.mxu0 %v411_v24 }
 0x1c3   :  { %439 = vmatpush.msrb.mxu0 %v410_v26 }
 0x1c5   :  { %440 = vmatpush.msrb.mxu0 %v409_v27  ;;  %v716_v27 = vld [vmem:[#allocation10 + $0x478] sm:$0xff] }
 0x1c7   :  { %639 = vmatpush.msra.mxu0 %v638_v29 }
 0x1c9   :  { %640 = vmatpush.msra.mxu0 %v637_v31 }
 0x1cb   :  { %641 = vmatpush.msra.mxu0 %v636_v34  ;;  %v715_v34 = vld [vmem:[#allocation10 + $0x470] sm:$0xff] }
 0x1cd   :  { %642 = vmatpush.msra.mxu0 %v635_v35  ;;  %v714_v35 = vld [vmem:[#allocation10 + $0x468] sm:$0xff] }
 0x1cf   :  { %643 = vmatpush.msra.mxu0 %v634_v36  ;;  %v713_v36 = vld [vmem:[#allocation10 + $0x460] sm:$0xff] }
 0x1d1   :  { %644 = vmatpush.msra.mxu0 %v633_v37  ;;  %v712_v37 = vld [vmem:[#allocation10 + $0x458] sm:$0xff] }
 0x1d3   :  { %645 = vmatpush.msra.mxu0 %v632_v39  ;;  %v711_v39 = vld [vmem:[#allocation10 + $0x450] sm:$0xff] }
 0x1d5   :  { %646 = vmatpush.msra.mxu0 %v631_v40  ;;  %v710_v40 = vld [vmem:[#allocation10 + $0x448] sm:$0xff] }
 0x1d7   :  { %647 = vmatpush.msra.mxu0 %v630_v41  ;;  %v709_v41 = vld [vmem:[#allocation10 + $0x440] sm:$0xff] }
 0x1d9   :  { %648 = vmatpush.msra.mxu0 %v629_v42  ;;  %v708_v42 = vld [vmem:[#allocation10 + $0x438] sm:$0xff] }
 0x1db   :  { %649 = vmatpush.msra.mxu0 %v628_v44  ;;  %v707_v44 = vld [vmem:[#allocation10 + $0x430] sm:$0xff] }
 0x1dd   :  { %650 = vmatpush.msra.mxu0 %v627_v45  ;;  %v706_v45 = vld [vmem:[#allocation10 + $0x428] sm:$0xff] }
 0x1df   :  { %v262_v50 = vpop.f32.mrf.mxu2  ;;  %651 = vmatpush.msra.mxu0 %v626_v47  ;;  %v705_v47 = vld [vmem:[#allocation10 + $0x420] sm:$0xff] }
 0x1e0   :  { %v263_v51 = vadd.f32 %v262_v50, %v244_v49  ;;  %v623_v50 = vld [vmem:[#allocation10 + $0x380] sm:$0xff] }
 0x1e1   :  { %652 = vmatpush.msra.mxu0 %v625_v48  ;;  %v704_v48 = vld [vmem:[#allocation10 + $0x418] sm:$0xff] }
 0x1e2   :  { %v274_v52 = vmax.f32 %v263_v51, 0.0 }
 0x1e4   :  { %311 = vmatmul.f32.vlgmr.msra.gmra.mxu3 %v274_v52 }
 0x1e7   :  { %v265_v53 = vpop.f32.mrf.mxu2 }
 0x1e8   :  { %v266_v54 = vadd.f32 %v265_v53, %v244_v49 }
 0x1ea   :  { %v275_v55 = vmax.f32 %v266_v54, 0.0 }
 0x1ec   :  { %314 = vmatmul.f32.gmra.mxu3 %v275_v55 }
 0x1ef   :  { %v268_v56 = vpop.f32.mrf.mxu2 }
 0x1f0   :  { %v269_v57 = vadd.f32 %v268_v56, %v244_v49 }
 0x1f2   :  { %v276_v58 = vmax.f32 %v269_v57, 0.0 }
 0x1f4   :  { %317 = vmatmul.f32.gmra.mxu3 %v276_v58 }
 0x1f7   :  { %v271_v59 = vpop.f32.mrf.mxu2 }
 0x1f8   :  { %v272_v60 = vadd.f32 %v271_v59, %v244_v49  ;;  %v624_v49 = vld [vmem:[#allocation10 + $0x388] sm:$0xff]  ;;  %v507_v59 = vld [vmem:[#allocation10 + $0x2f8] sm:$0xff] }
 0x1f9   :  { %653 = vmatpush.msra.mxu0 %v624_v49  ;;  %509 = vmatpush.msrb.mxu3 %v507_v59  ;;  %v703_v49 = vld [vmem:[#allocation10 + $0x410] sm:$0xff] }
 0x1fa   :  { %v277_v61 = vmax.f32 %v272_v60, 0.0  ;;  %v503_v60 = vld [vmem:[#allocation10 + $0x2d8] sm:$0xff] }
 0x1fb   :  { %654 = vmatpush.msra.mxu0 %v623_v50  ;;  %v702_v50 = vld [vmem:[#allocation10 + $0x408] sm:$0xff] }
 0x1fc   :  { %320 = vmatmul.f32.gmra.mxu3 %v277_v61  ;;  %v501_v61 = vld [vmem:[#allocation10 + $0x2c8] sm:$0xff] }
 0x1ff   :  { %v471_v7 = vpop.f32.mrf.mxu2 }
 0x207   :  { %v474_v12 = vpop.f32.mrf.mxu2 }
 0x20f   :  { %v477_v18 = vpop.f32.mrf.mxu2 }
 0x217   :  { %v480_v23 = vpop.f32.mrf.mxu2 }
 0x267   :  { %v312_v62 = vpop.f32.mrf.mxu3 }
 0x268   :  { %v313_v8 = vadd.f32 %v312_v62, %v294_v1  ;;  %v500_v62 = vld [vmem:[#allocation10 + $0x2c0] sm:$0xff] }
 0x26a   :  { %v1585_v13 = vmax.f32 %v313_v8, 0.0 }
 0x26f   :  { %v315_v63 = vpop.f32.mrf.mxu3 }
 0x270   :  { %v316_v5 = vadd.f32 %v315_v63, %v294_v1  ;;  %v499_v63 = vld [vmem:[#allocation10 + $0x2b8] sm:$0xff] }
 0x272   :  { %v1581_v11 = vmax.f32 %v316_v5, 0.0  ;;  %v493_v5 = vld [vmem:[#allocation10 + $0x288] sm:$0xff] }
 0x277   :  { %v318_v0 = vpop.f32.mrf.mxu3 }
 0x278   :  { %v319_v3 = vadd.f32 %v318_v0, %v294_v1  ;;  %v498_v0 = vld [vmem:[#allocation10 + $0x2b0] sm:$0xff] }
 0x27a   :  { %v1577_v9 = vmax.f32 %v319_v3, 0.0  ;;  %v495_v3 = vld [vmem:[#allocation10 + $0x298] sm:$0xff] }
 0x27f   :  { %v321_v2 = vpop.f32.mrf.mxu3 }
 0x280   :  { %v322_v4 = vadd.f32 %v321_v2, %v294_v1  ;;  %v497_v1 = vld [vmem:[#allocation10 + $0x2a8] sm:$0xff]  ;;  %v496_v2 = vld [vmem:[#allocation10 + $0x2a0] sm:$0xff] }
 0x282   :  { %v1575_v6 = vmax.f32 %v322_v4, 0.0  ;;  %v494_v4 = vld [vmem:[#allocation10 + $0x290] sm:$0xff] }
 0x284   :  { %360 = vmatpush.msrb.mxu1 %v1575_v6  ;;  %865 = vmatpush.msrb.mxu2 %v1575_v6 }
 0x286   :  { %361 = vmatpush.msrb.mxu1 %v1577_v9  ;;  %866 = vmatpush.msrb.mxu2 %v1577_v9 }
 0x288   :  { %362 = vmatpush.msrb.mxu1 %v1581_v11  ;;  %867 = vmatpush.msrb.mxu2 %v1581_v11 }
 0x28a   :  { %363 = vmatpush.msrb.mxu1 %v1585_v13  ;;  %868 = vmatpush.msrb.mxu2 %v1585_v13 }
 0x28b   :  { %1278 = vmatmul.msk.f32.vlgmr.msrb.gmra.mxu1 %vm174_vm0, %v1554_v33 }
 0x293   :  { %1279 = vmatmul.msk.f32.gmra.mxu1 %vm174_vm0, %v1559_v38 }
 0x29b   :  { %1280 = vmatmul.msk.f32.gmra.mxu1 %vm174_vm0, %v1563_v43 }
 0x2a3   :  { %1281 = vmatmul.msk.f32.gmra.mxu1 %vm174_vm0, %v1567_v46 }
 0x308   :  { %v365_v51 = vpop.f32.mrf.mxu1 }
 0x309   :  { %v377_v52 = vadd.f32 %v365_v51, %v1585_v13  ;;  %v701_v51 = vld [vmem:[#allocation10 + $0x400] sm:$0xff] }
 0x30b   :  { %441 = vmatmul.f32.vlgmr.msrb.gmra.mxu0 %v377_v52 }
 0x30c   :  { %845 = vmatpush.msrb.mxu0 %v1543_v25  ;;  %v506_v25 = vld [vmem:[#allocation10 + $0x2f0] sm:$0xff] }
 0x30d   :  { %510 = vmatpush.msrb.mxu3 %v506_v25 }
 0x30e   :  { %846 = vmatpush.msrb.mxu0 %v1545_v28  ;;  %v505_v28 = vld [vmem:[#allocation10 + $0x2e8] sm:$0xff] }
 0x30f   :  { %511 = vmatpush.msrb.mxu3 %v505_v28 }
 0x310   :  { %847 = vmatpush.msrb.mxu0 %v1548_v30  ;;  %v368_v53 = vpop.f32.mrf.mxu1  ;;  %v504_v30 = vld [vmem:[#allocation10 + $0x2e0] sm:$0xff] }
 0x311   :  { %v378_v54 = vadd.f32 %v368_v53, %v1581_v11  ;;  %512 = vmatpush.msrb.mxu3 %v504_v30 }
 0x312   :  { %848 = vmatpush.msrb.mxu0 %v1551_v32  ;;  %v502_v32 = vld [vmem:[#allocation10 + $0x2d0] sm:$0xff] }
 0x313   :  { %444 = vmatmul.f32.gmra.mxu0 %v378_v54  ;;  %513 = vmatpush.msrb.mxu3 %v503_v60 }
 0x315   :  { %514 = vmatpush.msrb.mxu3 %v502_v32 }
 0x317   :  { %515 = vmatpush.msrb.mxu3 %v501_v61  ;;  %v774_v61 = vld [vmem:[#allocation10 + $0x4f8] sm:$0xff] }
 0x318   :  { %v371_v55 = vpop.f32.mrf.mxu1 }
 0x319   :  { %v379_v56 = vadd.f32 %v371_v55, %v1577_v9  ;;  %516 = vmatpush.msrb.mxu3 %v500_v62  ;;  %v483_v9 = vld [vmem:[#allocation13 + $0x30] ss:$0 sm:$0xff]  ;;  %v508_v55 = vld [vmem:[#allocation13 + $0x40] ss:$0 sm:$0xff] }
 0x31a   :  { %v773_v62 = vld [vmem:[#allocation10 + $0x4f0] sm:$0xff] }
 0x31b   :  { %447 = vmatmul.f32.gmra.mxu0 %v379_v56  ;;  %517 = vmatpush.msrb.mxu3 %v499_v63  ;;  %v772_v63 = vld [vmem:[#allocation10 + $0x4e8] sm:$0xff] }
 0x31d   :  { %518 = vmatpush.msrb.mxu3 %v498_v0  ;;  %v771_v0 = vld [vmem:[#allocation10 + $0x4e0] sm:$0xff] }
 0x31f   :  { %519 = vmatpush.msrb.mxu3 %v497_v1 }
 0x320   :  { %v374_v57 = vpop.f32.mrf.mxu1 }
 0x321   :  { %v380_v58 = vadd.f32 %v374_v57, %v1575_v6  ;;  %520 = vmatpush.msrb.mxu3 %v496_v2  ;;  %v492_v6 = vld [vmem:[#allocation10 + $0x280] sm:$0xff] }
 0x323   :  { %450 = vmatmul.f32.gmra.mxu0 %v380_v58  ;;  %521 = vmatpush.msrb.mxu3 %v495_v3  ;;  %v770_v3 = vld [vmem:[#allocation10 + $0x4d8] sm:$0xff] }
 0x325   :  { %522 = vmatpush.msrb.mxu3 %v494_v4 }
 0x327   :  { %523 = vmatpush.msrb.mxu3 %v493_v5  ;;  %v766_v5 = vld [vmem:[#allocation10 + $0x4b8] sm:$0xff] }
 0x329   :  { %524 = vmatpush.msrb.mxu3 %v492_v6  ;;  %v765_v6 = vld [vmem:[#allocation10 + $0x4b0] sm:$0xff] }
 0x32b   :  { %655 = vmatmul.f32.vlgmr.msra.gmra.mxu0 %v377_v52  ;;  %717 = vmatpush.msra.mxu3 %v716_v27 }
 0x32d   :  { %718 = vmatpush.msra.mxu3 %v715_v34 }
 0x32f   :  { %719 = vmatpush.msra.mxu3 %v714_v35 }
 0x331   :  { %720 = vmatpush.msra.mxu3 %v713_v36 }
 0x333   :  { %658 = vmatmul.f32.gmra.mxu0 %v378_v54  ;;  %721 = vmatpush.msra.mxu3 %v712_v37 }
 0x335   :  { %722 = vmatpush.msra.mxu3 %v711_v39 }
 0x337   :  { %723 = vmatpush.msra.mxu3 %v710_v40 }
 0x339   :  { %724 = vmatpush.msra.mxu3 %v709_v41 }
 0x33b   :  { %661 = vmatmul.f32.gmra.mxu0 %v379_v56  ;;  %725 = vmatpush.msra.mxu3 %v708_v42 }
 0x33d   :  { %726 = vmatpush.msra.mxu3 %v707_v44 }
 0x33f   :  { %727 = vmatpush.msra.mxu3 %v706_v45 }
 0x341   :  { %728 = vmatpush.msra.mxu3 %v705_v47 }
 0x343   :  { %664 = vmatmul.f32.gmra.mxu0 %v380_v58  ;;  %729 = vmatpush.msra.mxu3 %v704_v48 }
 0x345   :  { %730 = vmatpush.msra.mxu3 %v703_v49 }
 0x347   :  { %731 = vmatpush.msra.mxu3 %v702_v50 }
 0x349   :  { %732 = vmatpush.msra.mxu3 %v701_v51 }
 0x388   :  { %v442_v8 = vpop.f32.mrf.mxu0 }
 0x389   :  { %v472_v10 = vadd.f32 %v471_v7, %v442_v8  ;;  %v764_v7 = vld [vmem:[#allocation10 + $0x4a8] sm:$0xff]  ;;  %v763_v8 = vld [vmem:[#allocation10 + $0x4a0] sm:$0xff] }
 0x38b   :  { %v484_v11 = vadd.f32 %v483_v9, %v472_v10 }
 0x38d   :  { %v488_v13 = vmax.f32 %v484_v11, 0.0 }
 0x38f   :  { %525 = vmatmul.f32.vlgmr.msrb.gmra.mxu3 %v488_v13  ;;  %v762_v13 = vld [vmem:[#allocation10 + $0x498] sm:$0xff] }
 0x390   :  { %v445_v14 = vpop.f32.mrf.mxu0 }
 0x391   :  { %v475_v15 = vadd.f32 %v474_v12, %v445_v14  ;;  %v761_v14 = vld [vmem:[#allocation10 + $0x490] sm:$0xff] }
 0x393   :  { %v485_v16 = vadd.f32 %v483_v9, %v475_v15  ;;  %v760_v15 = vld [vmem:[#allocation10 + $0x488] sm:$0xff] }
 0x395   :  { %v489_v17 = vmax.f32 %v485_v16, 0.0  ;;  %v759_v16 = vld [vmem:[#allocation10 + $0x480] sm:$0xff] }
 0x397   :  { %528 = vmatmul.f32.gmra.mxu3 %v489_v17 }
 0x398   :  { %v448_v19 = vpop.f32.mrf.mxu0 }
 0x399   :  { %v478_v20 = vadd.f32 %v477_v18, %v448_v19  ;;  %v685_v18 = vpop.f32.mrf.mxu2 }
 0x39b   :  { %v486_v21 = vadd.f32 %v483_v9, %v478_v20 }
 0x39d   :  { %v490_v22 = vmax.f32 %v486_v21, 0.0 }
 0x39f   :  { %531 = vmatmul.f32.gmra.mxu3 %v490_v22  ;;  %v750_v22 = vld [vmem:[#allocation13 + $0x50] ss:$0 sm:$0xff] }
 0x3a0   :  { %v451_v24 = vpop.f32.mrf.mxu0 }
 0x3a1   :  { %v481_v26 = vadd.f32 %v480_v23, %v451_v24  ;;  %v688_v24 = vpop.f32.mrf.mxu2 }
 0x3a3   :  { %v487_v29 = vadd.f32 %v483_v9, %v481_v26 }
 0x3a5   :  { %v491_v31 = vmax.f32 %v487_v29, 0.0 }
 0x3a7   :  { %534 = vmatmul.f32.gmra.mxu3 %v491_v31 }
 0x3a8   :  { %v656_v17 = vpop.f32.mrf.mxu0 }
 0x3a9   :  { %v686_v19 = vadd.f32 %v685_v18, %v656_v17  ;;  %v691_v37 = vpop.f32.mrf.mxu2  ;;  %v950_v17 = vld [vmem:[#allocation12 + $0x250] sm:$0xff] }
 0x3aa   :  { %v918_v18 = vld [vmem:[#allocation12 + $0x50] sm:$0xff] }
 0x3b0   :  { %v659_v20 = vpop.f32.mrf.mxu0 }
 0x3b1   :  { %v689_v29 = vadd.f32 %v688_v24, %v659_v20  ;;  %v694_v48 = vpop.f32.mrf.mxu2 }
 0x3b8   :  { %v662_v35 = vpop.f32.mrf.mxu0 }
 0x3b9   :  { %v692_v40 = vadd.f32 %v691_v37, %v662_v35  ;;  %v916_v35 = vld [vmem:[#allocation12 + $0x30] sm:$0xff] }
 0x3c0   :  { %v665_v45 = vpop.f32.mrf.mxu0 }
 0x3c1   :  { %v695_v49 = vadd.f32 %v694_v48, %v665_v45  ;;  %v976_v45 = vld [vmem:[#allocation12 + $0x3f0] sm:$0xff] }
 0x3c2   :  { %v974_v48 = vld [vmem:[#allocation12 + $0x3d0] sm:$0xff] }
 0x412   :  { %v526_v52 = vpop.f32.mrf.mxu3 }
 0x413   :  { %v527_v28 = vadd.f32 %v526_v52, %v508_v55 }
 0x415   :  { %v538_v32 = vmax.f32 %v527_v28, 0.0  ;;  %v942_v28 = vld [vmem:[#allocation12 + $0x1d0] sm:$0xff] }
 0x41a   :  { %v529_v53 = vpop.f32.mrf.mxu3 }
 0x41b   :  { %v530_v59 = vadd.f32 %v529_v53, %v508_v55 }
 0x41d   :  { %v539_v60 = vmax.f32 %v530_v59, 0.0  ;;  %v928_v59 = vld [vmem:[#allocation12 + $0xf0] sm:$0xff] }
 0x422   :  { %v532_v54 = vpop.f32.mrf.mxu3 }
 0x423   :  { %v533_v57 = vadd.f32 %v532_v54, %v508_v55  ;;  %v1615_v54 = vld [vmem:[#allocation9] sm:$0x3] }
 0x424   :  { %1287 = vmatmul.msk.f32.vlgmr.msrb.gmra.mxu2 %vm174_vm0, %v1615_v54  ;;  %1286 = vmatmul.msk.f32.vlgmr.msrb.gmra.mxu0 %vm174_vm0, %v1615_v54 }
 0x425   :  { %v540_v30 = vmax.f32 %v533_v57, 0.0  ;;  %v943_v57 = vld [vmem:[#allocation12 + $0x1e0] sm:$0xff] }
 0x42a   :  { %v535_v56 = vpop.f32.mrf.mxu3 }
 0x42b   :  { %v536_v58 = vadd.f32 %v535_v56, %v508_v55  ;;  %v944_v56 = vld [vmem:[#allocation12 + $0x1f0] sm:$0xff] }
 0x42c   :  { %998 = vmatpush.msra.mxu2 %v944_v56  ;;  %v967_v56 = vld [vmem:[#allocation12 + $0x360] sm:$0xff] }
 0x42d   :  { %v541_v25 = vmax.f32 %v536_v58, 0.0  ;;  %v960_v58 = vld [vmem:[#allocation12 + $0x2f0] sm:$0xff] }
 0x42e   :  { %999 = vmatpush.msra.mxu2 %v943_v57  ;;  %v929_v57 = vld [vmem:[#allocation12 + $0x100] sm:$0xff] }
 0x42f   :  { %574 = vmatpush.msra.mxu1 %v541_v25  ;;  %885 = vmatpush.msrb.mxu3 %v541_v25 }
 0x430   :  { %1000 = vmatpush.msra.mxu2 %v942_v28  ;;  %v945_v28 = vld [vmem:[#allocation12 + $0x200] sm:$0xff] }
 0x431   :  { %575 = vmatpush.msra.mxu1 %v540_v30  ;;  %886 = vmatpush.msrb.mxu3 %v540_v30 }
 0x433   :  { %576 = vmatpush.msra.mxu1 %v539_v60  ;;  %887 = vmatpush.msrb.mxu3 %v539_v60 }
 0x435   :  { %577 = vmatpush.msra.mxu1 %v538_v32  ;;  %888 = vmatpush.msrb.mxu3 %v538_v32 }
 0x436   :  { %1282 = vmatmul.msk.f32.vlgmr.msra.gmra.mxu1 %vm174_vm0, %v1554_v33  ;;  %v769_v33 = vld [vmem:[#allocation10 + $0x4d0] sm:$0xff] }
 0x437   :  { %776 = vmatpush.msrb.mxu1 %v774_v61 }
 0x439   :  { %777 = vmatpush.msrb.mxu1 %v773_v62  ;;  %v941_v62 = vld [vmem:[#allocation12 + $0x1c0] sm:$0xff] }
 0x43a   :  { %1001 = vmatpush.msra.mxu2 %v941_v62  ;;  %v962_v62 = vld [vmem:[#allocation12 + $0x310] sm:$0xff] }
 0x43b   :  { %778 = vmatpush.msrb.mxu1 %v772_v63  ;;  %v957_v63 = vld [vmem:[#allocation12 + $0x2c0] sm:$0xff] }
 0x43d   :  { %779 = vmatpush.msrb.mxu1 %v771_v0  ;;  %v925_v0 = vld [vmem:[#allocation12 + $0xc0] sm:$0xff] }
 0x43e   :  { %1283 = vmatmul.msk.f32.gmra.mxu1 %vm174_vm0, %v1559_v38  ;;  %v768_v38 = vld [vmem:[#allocation10 + $0x4c8] sm:$0xff] }
 0x43f   :  { %780 = vmatpush.msrb.mxu1 %v770_v3  ;;  %v924_v3 = vld [vmem:[#allocation12 + $0xb0] sm:$0xff] }
 0x441   :  { %781 = vmatpush.msrb.mxu1 %v769_v33  ;;  %v939_v33 = vld [vmem:[#allocation12 + $0x1a0] sm:$0xff] }
 0x443   :  { %782 = vmatpush.msrb.mxu1 %v768_v38  ;;  %v955_v38 = vld [vmem:[#allocation12 + $0x2a0] sm:$0xff] }
 0x446   :  { %1284 = vmatmul.msk.f32.gmra.mxu1 %vm174_vm0, %v1563_v43  ;;  %v767_v43 = vld [vmem:[#allocation10 + $0x4c0] sm:$0xff] }
 0x447   :  { %783 = vmatpush.msrb.mxu1 %v767_v43  ;;  %v923_v43 = vld [vmem:[#allocation12 + $0xa0] sm:$0xff] }
 0x449   :  { %784 = vmatpush.msrb.mxu1 %v766_v5  ;;  %v922_v5 = vld [vmem:[#allocation12 + $0x90] sm:$0xff] }
 0x44b   :  { %785 = vmatpush.msrb.mxu1 %v765_v6 }
 0x44d   :  { %786 = vmatpush.msrb.mxu1 %v764_v7  ;;  %v937_v7 = vld [vmem:[#allocation12 + $0x180] sm:$0xff] }
 0x44e   :  { %1285 = vmatmul.msk.f32.gmra.mxu1 %vm174_vm0, %v1567_v46 }
 0x44f   :  { %787 = vmatpush.msrb.mxu1 %v763_v8  ;;  %v953_v8 = vld [vmem:[#allocation12 + $0x280] sm:$0xff] }
 0x451   :  { %788 = vmatpush.msrb.mxu1 %v762_v13  ;;  %v935_v13 = vld [vmem:[#allocation12 + $0x160] sm:$0xff] }
 0x453   :  { %789 = vmatpush.msrb.mxu1 %v761_v14  ;;  %v951_v14 = vld [vmem:[#allocation12 + $0x260] sm:$0xff] }
 0x455   :  { %790 = vmatpush.msrb.mxu1 %v760_v15  ;;  %v919_v15 = vld [vmem:[#allocation12 + $0x60] sm:$0xff] }
 0x457   :  { %791 = vmatpush.msrb.mxu1 %v759_v16  ;;  %v934_v16 = vld [vmem:[#allocation12 + $0x150] sm:$0xff] }
 0x459   :  { %978 = vmatpush.msra.mxu1 %v928_v59  ;;  %v966_v59 = vld [vmem:[#allocation12 + $0x350] sm:$0xff] }
 0x4b3   :  { %v579_v1 = vpop.f32.mrf.mxu1 }
 0x4b4   :  { %v591_v2 = vadd.f32 %v579_v1, %v538_v32  ;;  %v926_v32 = vld [vmem:[#allocation12 + $0xd0] sm:$0xff] }
 0x4b5   :  { %v940_v1 = vld [vmem:[#allocation12 + $0x1b0] sm:$0xff] }
 0x4b6   :  { %733 = vmatmul.f32.vlgmr.msra.gmra.mxu3 %v591_v2  ;;  %v956_v2 = vld [vmem:[#allocation12 + $0x2b0] sm:$0xff]  ;;  %1002 = vmatpush.msra.mxu2 %v940_v1 }
 0x4b7   :  { %1018 = vmatpush.msra.mxu3 %v960_v58  ;;  %v946_v58 = vld [vmem:[#allocation12 + $0x210] sm:$0xff] }
 0x4b8   :  { %1003 = vmatpush.msra.mxu2 %v939_v33  ;;  %v1075_v33 = vld [vmem:[#allocation12 + $0x4e0] sm:$0xff] }
 0x4bb   :  { %v582_v4 = vpop.f32.mrf.mxu1 }
 0x4bc   :  { %v592_v46 = vadd.f32 %v582_v4, %v539_v60  ;;  %v958_v60 = vld [vmem:[#allocation12 + $0x2d0] sm:$0xff] }
 0x4bd   :  { %v938_v4 = vld [vmem:[#allocation12 + $0x190] sm:$0xff] }
 0x4be   :  { %736 = vmatmul.f32.gmra.mxu3 %v592_v46  ;;  %v954_v46 = vld [vmem:[#allocation12 + $0x290] sm:$0xff]  ;;  %1004 = vmatpush.msra.mxu2 %v938_v4 }
 0x4bf   :  { %v1072_v4 = vld [vmem:[#allocation12 + $0x4b0] sm:$0xff] }
 0x4c0   :  { %1005 = vmatpush.msra.mxu2 %v937_v7  ;;  %v1068_v7 = vld [vmem:[#allocation12 + $0x470] sm:$0xff] }
 0x4c3   :  { %v585_v9 = vpop.f32.mrf.mxu1 }
 0x4c4   :  { %v593_v10 = vadd.f32 %v585_v9, %v540_v30  ;;  %v927_v30 = vld [vmem:[#allocation12 + $0xe0] sm:$0xff] }
 0x4c5   :  { %979 = vmatpush.msra.mxu1 %v927_v30  ;;  %v921_v9 = vld [vmem:[#allocation12 + $0x80] sm:$0xff] }
 0x4c6   :  { %739 = vmatmul.f32.gmra.mxu3 %v593_v10  ;;  %v936_v10 = vld [vmem:[#allocation12 + $0x170] sm:$0xff]  ;;  %v965_v30 = vld [vmem:[#allocation12 + $0x340] sm:$0xff] }
 0x4c7   :  { %980 = vmatpush.msra.mxu1 %v926_v32  ;;  %1006 = vmatpush.msra.mxu2 %v936_v10  ;;  %v964_v32 = vld [vmem:[#allocation12 + $0x330] sm:$0xff] }
 0x4c8   :  { %v1066_v10 = vld [vmem:[#allocation12 + $0x450] sm:$0xff] }
 0x4c9   :  { %981 = vmatpush.msra.mxu1 %v925_v0  ;;  %1007 = vmatpush.msra.mxu2 %v935_v13  ;;  %v870_v0 = vpop.f32.mrf.mxu2  ;;  %v1063_v13 = vld [vmem:[#allocation12 + $0x420] sm:$0xff] }
 0x4cb   :  { %v588_v11 = vpop.f32.mrf.mxu1  ;;  %982 = vmatpush.msra.mxu1 %v924_v3  ;;  %1008 = vmatpush.msra.mxu2 %v934_v16  ;;  %v1076_v3 = vld [vmem:[#allocation12 + $0x4f0] sm:$0xff] }
 0x4cc   :  { %v594_v12 = vadd.f32 %v588_v11, %v541_v25  ;;  %v959_v25 = vld [vmem:[#allocation12 + $0x2e0] sm:$0xff]  ;;  %v952_v11 = vld [vmem:[#allocation12 + $0x270] sm:$0xff] }
 0x4cd   :  { %1019 = vmatpush.msra.mxu3 %v959_v25  ;;  %983 = vmatpush.msra.mxu1 %v923_v43  ;;  %v914_v25 = vld [vmem:[#allocation12 + $0x10] sm:$0xff]  ;;  %v1073_v43 = vld [vmem:[#allocation12 + $0x4c0] sm:$0xff] }
 0x4ce   :  { %742 = vmatmul.f32.gmra.mxu3 %v594_v12  ;;  %v920_v12 = vld [vmem:[#allocation12 + $0x70] sm:$0xff] }
 0x4cf   :  { %1020 = vmatpush.msra.mxu3 %v958_v60  ;;  %984 = vmatpush.msra.mxu1 %v922_v5  ;;  %v913_v60 = vld [vmem:[#allocation12] sm:$0xff]  ;;  %v1070_v5 = vld [vmem:[#allocation12 + $0x490] sm:$0xff] }
 0x4d0   :  { %v1129_v16 = vld [vmem:[#allocation12 + $0x5f0] sm:$0xff] }
 0x4d1   :  { %1021 = vmatpush.msra.mxu3 %v957_v63  ;;  %985 = vmatpush.msra.mxu1 %v921_v9  ;;  %v850_v63 = vpop.f32.mrf.mxu0 }
 0x4d3   :  { %1022 = vmatpush.msra.mxu3 %v956_v2  ;;  %986 = vmatpush.msra.mxu1 %v920_v12  ;;  %v961_v2 = vld [vmem:[#allocation12 + $0x300] sm:$0xff]  ;;  %v1064_v12 = vld [vmem:[#allocation12 + $0x430] sm:$0xff] }
 0x4d5   :  { %1023 = vmatpush.msra.mxu3 %v955_v38  ;;  %987 = vmatpush.msra.mxu1 %v919_v15  ;;  %v1074_v38 = vld [vmem:[#allocation12 + $0x4d0] sm:$0xff]  ;;  %v1061_v15 = vld [vmem:[#allocation12 + $0x400] sm:$0xff] }
 0x4d6   :  { %1288 = vmatmul.msk.f32.vlgmr.msrb.gmra.mxu3 %vm174_vm0, %v1615_v54 }
 0x4d7   :  { %1024 = vmatpush.msra.mxu3 %v954_v46  ;;  %988 = vmatpush.msra.mxu1 %v918_v18  ;;  %v1071_v46 = vld [vmem:[#allocation12 + $0x4a0] sm:$0xff]  ;;  %v1130_v18 = vld [vmem:[#allocation12 + $0x5f8] sm:$0xff] }
 0x4d9   :  { %1025 = vmatpush.msra.mxu3 %v953_v8  ;;  %v1067_v8 = vld [vmem:[#allocation12 + $0x460] sm:$0xff] }
 0x4db   :  { %1026 = vmatpush.msra.mxu3 %v952_v11  ;;  %v1065_v11 = vld [vmem:[#allocation12 + $0x440] sm:$0xff] }
 0x4dd   :  { %1027 = vmatpush.msra.mxu3 %v951_v14  ;;  %v1062_v14 = vld [vmem:[#allocation12 + $0x410] sm:$0xff] }
 0x4df   :  { %1028 = vmatpush.msra.mxu3 %v950_v17  ;;  %v1127_v17 = vld [vmem:[#allocation12 + $0x5e0] sm:$0xff] }
 0x539   :  { %v734_v21 = vpop.f32.mrf.mxu3 }
 0x53a   :  { %v746_v23 = vadd.f32 %v734_v21, %v686_v19  ;;  %v775_v19 = vld [vmem:[#allocation13 + $0x60] ss:$0 sm:$0xff] }
 0x53b   :  { %v933_v21 = vld [vmem:[#allocation12 + $0x140] sm:$0xff] }
 0x53c   :  { %v751_v26 = vadd.f32 %v750_v22, %v746_v23  ;;  %1009 = vmatpush.msra.mxu2 %v933_v21  ;;  %v1126_v21 = vld [vmem:[#allocation12 + $0x5d8] sm:$0xff] }
 0x53e   :  { %v755_v27 = vmax.f32 %v751_v26, 0.0  ;;  %v917_v26 = vld [vmem:[#allocation12 + $0x40] sm:$0xff] }
 0x53f   :  { %989 = vmatpush.msra.mxu1 %v917_v26  ;;  %v1122_v26 = vld [vmem:[#allocation12 + $0x5b8] sm:$0xff] }
 0x540   :  { %792 = vmatmul.f32.vlgmr.msrb.gmra.mxu1 %v755_v27  ;;  %v932_v27 = vld [vmem:[#allocation12 + $0x130] sm:$0xff] }
 0x541   :  { %v737_v31 = vpop.f32.mrf.mxu3  ;;  %1010 = vmatpush.msra.mxu2 %v932_v27  ;;  %990 = vmatpush.msra.mxu1 %v916_v35  ;;  %v1119_v27 = vld [vmem:[#allocation12 + $0x5a0] sm:$0xff] }
 0x542   :  { %v747_v34 = vadd.f32 %v737_v31, %v689_v29  ;;  %v1115_v35 = vld [vmem:[#allocation12 + $0x580] sm:$0xff] }
 0x544   :  { %v752_v36 = vadd.f32 %v750_v22, %v747_v34  ;;  %v948_v34 = vld [vmem:[#allocation12 + $0x230] sm:$0xff] }
 0x546   :  { %v756_v39 = vmax.f32 %v752_v36, 0.0  ;;  %v931_v36 = vld [vmem:[#allocation12 + $0x120] sm:$0xff] }
 0x547   :  { %1011 = vmatpush.msra.mxu2 %v931_v36  ;;  %v1116_v36 = vld [vmem:[#allocation12 + $0x588] sm:$0xff] }
 0x548   :  { %795 = vmatmul.f32.gmra.mxu1 %v756_v39 }
 0x549   :  { %v740_v41 = vpop.f32.mrf.mxu3 }
 0x54a   :  { %v748_v42 = vadd.f32 %v740_v41, %v692_v40  ;;  %v947_v40 = vld [vmem:[#allocation12 + $0x220] sm:$0xff]  ;;  %v930_v41 = vld [vmem:[#allocation12 + $0x110] sm:$0xff] }
 0x54b   :  { %1012 = vmatpush.msra.mxu2 %v930_v41  ;;  %v1114_v41 = vld [vmem:[#allocation12 + $0x578] sm:$0xff] }
 0x54c   :  { %v753_v44 = vadd.f32 %v750_v22, %v748_v42 }
 0x54d   :  { %1013 = vmatpush.msra.mxu2 %v929_v57 }
 0x54e   :  { %v757_v47 = vmax.f32 %v753_v44, 0.0  ;;  %1014 = vmatmul.f32.vlgmr.msra.gmra.mxu2 %v870_v0  ;;  %v1194_v0 = vld [vmem:[#allocation12 + $0x6e0] sm:$0xff] }
 0x54f   :  { %1138 = vmatpush.msrb.mxu2 %v1129_v16  ;;  %v1201_v16 = vld [vmem:[#allocation12 + $0x750] sm:$0xff] }
 0x550   :  { %798 = vmatmul.f32.gmra.mxu1 %v757_v47  ;;  %v975_v47 = vld [vmem:[#allocation12 + $0x3e0] sm:$0xff] }
 0x551   :  { %v743_v50 = vpop.f32.mrf.mxu3  ;;  %1139 = vmatpush.msrb.mxu2 %v1127_v17  ;;  %v1184_v17 = vld [vmem:[#allocation12 + $0x640] sm:$0xff] }
 0x552   :  { %v749_v51 = vadd.f32 %v743_v50, %v695_v49  ;;  %v973_v49 = vld [vmem:[#allocation12 + $0x3c0] sm:$0xff]  ;;  %v972_v50 = vld [vmem:[#allocation12 + $0x3b0] sm:$0xff] }
 0x554   :  { %v754_v52 = vadd.f32 %v750_v22, %v749_v51  ;;  %v949_v22 = vld [vmem:[#allocation12 + $0x240] sm:$0xff] }
 0x555   :  { %1029 = vmatpush.msra.mxu3 %v949_v22  ;;  %v971_v51 = vld [vmem:[#allocation12 + $0x3a0] sm:$0xff] }
 0x556   :  { %v758_v53 = vmax.f32 %v754_v52, 0.0  ;;  %v970_v52 = vld [vmem:[#allocation12 + $0x390] sm:$0xff]  ;;  %v1123_v22 = vld [vmem:[#allocation12 + $0x5c0] sm:$0xff] }
 0x557   :  { %1030 = vmatpush.msra.mxu3 %v948_v34  ;;  %v1118_v34 = vld [vmem:[#allocation12 + $0x598] sm:$0xff] }
 0x558   :  { %801 = vmatmul.f32.gmra.mxu1 %v758_v53  ;;  %v969_v53 = vld [vmem:[#allocation12 + $0x380] sm:$0xff] }
 0x559   :  { %1031 = vmatpush.msra.mxu3 %v947_v40  ;;  %v890_v1 = vpop.f32.mrf.mxu3  ;;  %v1113_v40 = vld [vmem:[#allocation12 + $0x570] sm:$0xff] }
 0x55b   :  { %1032 = vmatpush.msra.mxu3 %v946_v58 }
 0x55d   :  { %1033 = vmatpush.msra.mxu3 %v945_v28  ;;  %v1103_v28 = vld [vmem:[#allocation12 + $0x520] sm:$0xff] }
 0x55e   :  { %1034 = vmatmul.f32.vlgmr.msra.gmra.mxu3 %v890_v1  ;;  %v1211_v1 = vld [vmem:[#allocation12 + $0x7f0] sm:$0xff] }
 0x55f   :  { %1158 = vmatpush.msrb.mxu3 %v1130_v18  ;;  %v1200_v18 = vld [vmem:[#allocation12 + $0x740] sm:$0xff] }
 0x5bd   :  { %v1623_v55 = vpop.f32.mrf.mxu1 }
 0x5be   :  { %v794_v37 = vadd.f32 %v1623_v55, %v775_v19  ;;  %v968_v55 = vld [vmem:[#allocation12 + $0x370] sm:$0xff] }
 0x5c0   :  { %v805_v44 = vmax.f32 %v794_v37, 0.0  ;;  %v977_v37 = vld [vmem:[#allocation13 + $0x70] ss:$0 sm:$0xff] }
 0x5c5   :  { %v796_v61 = vpop.f32.mrf.mxu1 }
 0x5c6   :  { %v797_v29 = vadd.f32 %v796_v61, %v775_v19  ;;  %v963_v61 = vld [vmem:[#allocation12 + $0x320] sm:$0xff] }
 0x5c8   :  { %v806_v42 = vmax.f32 %v797_v29, 0.0  ;;  %v1120_v29 = vld [vmem:[#allocation12 + $0x5a8] sm:$0xff] }
 0x5cd   :  { %v799_v6 = vpop.f32.mrf.mxu1 }
 0x5ce   :  { %v800_v23 = vadd.f32 %v799_v6, %v775_v19  ;;  %v1069_v6 = vld [vmem:[#allocation12 + $0x480] sm:$0xff] }
 0x5d0   :  { %v807_v39 = vmax.f32 %v800_v23, 0.0  ;;  %v1124_v23 = vld [vmem:[#allocation12 + $0x5c8] sm:$0xff] }
 0x5d5   :  { %v802_v20 = vpop.f32.mrf.mxu1 }
 0x5d6   :  { %v803_v24 = vadd.f32 %v802_v20, %v775_v19  ;;  %v1128_v19 = vld [vmem:[#allocation12 + $0x5e8] sm:$0xff]  ;;  %v1125_v20 = vld [vmem:[#allocation12 + $0x5d0] sm:$0xff] }
 0x5d7   :  { %1159 = vmatpush.msrb.mxu3 %v1128_v19  ;;  %1140 = vmatpush.msrb.mxu2 %v1125_v20  ;;  %v1183_v19 = vld [vmem:[#allocation12 + $0x630] sm:$0xff]  ;;  %v1077_v20 = vld [vmem:[#allocation13 + $0x80] ss:$0 sm:$0xff] }
 0x5d8   :  { %v808_v31 = vmax.f32 %v803_v24, 0.0  ;;  %v1121_v24 = vld [vmem:[#allocation12 + $0x5b0] sm:$0xff] }
 0x5d9   :  { %1160 = vmatpush.msrb.mxu3 %v1126_v21  ;;  %1141 = vmatpush.msrb.mxu2 %v1123_v22 }
 0x5da   :  { %905 = vmatpush.msra.mxu0 %v808_v31  ;;  %v1117_v31 = vld [vmem:[#allocation12 + $0x590] sm:$0xff] }
 0x5db   :  { %1161 = vmatpush.msrb.mxu3 %v1124_v23  ;;  %1142 = vmatpush.msrb.mxu2 %v1121_v24  ;;  %v1199_v24 = vld [vmem:[#allocation12 + $0x730] sm:$0xff] }
 0x5dc   :  { %906 = vmatpush.msra.mxu0 %v807_v39 }
 0x5dd   :  { %1162 = vmatpush.msrb.mxu3 %v1122_v26  ;;  %1143 = vmatpush.msrb.mxu2 %v1119_v27  ;;  %v1182_v26 = vld [vmem:[#allocation12 + $0x620] sm:$0xff] }
 0x5de   :  { %907 = vmatpush.msra.mxu0 %v806_v42  ;;  %v1111_v42 = vld [vmem:[#allocation12 + $0x560] sm:$0xff] }
 0x5df   :  { %1163 = vmatpush.msrb.mxu3 %v1120_v29  ;;  %1144 = vmatpush.msrb.mxu2 %v1117_v31  ;;  %v1198_v27 = vld [vmem:[#allocation12 + $0x720] sm:$0xff]  ;;  %v1181_v29 = vld [vmem:[#allocation12 + $0x610] sm:$0xff] }
 0x5e0   :  { %908 = vmatpush.msra.mxu0 %v805_v44  ;;  %v1112_v44 = vld [vmem:[#allocation12 + $0x568] sm:$0xff]  ;;  %v1197_v31 = vld [vmem:[#allocation12 + $0x710] sm:$0xff] }
 0x5e1   :  { %1289 = vmatmul.msk.f32.vlgmr.msra.gmra.mxu0 %vm174_vm0, %v1615_v54  ;;  %v915_v54 = vld [vmem:[#allocation12 + $0x20] sm:$0xff]  ;;  %1164 = vmatpush.msrb.mxu3 %v1118_v34 }
 0x5e2   :  { %1038 = vmatpush.msrb.mxu0 %v976_v45  ;;  %991 = vmatpush.msra.mxu1 %v915_v54  ;;  %v1180_v34 = vld [vmem:[#allocation12 + $0x600] sm:$0xff] }
 0x5e3   :  { %1145 = vmatpush.msrb.mxu2 %v1115_v35  ;;  %1165 = vmatpush.msrb.mxu3 %v1116_v36  ;;  %v1196_v35 = vld [vmem:[#allocation12 + $0x700] sm:$0xff]  ;;  %v1132_v36 = vld [vmem:[#allocation13 + $0x90] ss:$8 sm:$0x3] }
 0x5e4   :  { %1039 = vmatpush.msrb.mxu0 %v975_v47  ;;  %992 = vmatpush.msra.mxu1 %v914_v25  ;;  %v1015_v47 = vpop.f32.mrf.mxu2  ;;  %v1106_v25 = vld [vmem:[#allocation12 + $0x538] sm:$0xff] }
 0x5e5   :  { %1146 = vmatpush.msrb.mxu2 %v1113_v40  ;;  %1166 = vmatpush.msrb.mxu3 %v1114_v41 }
 0x5e6   :  { %1040 = vmatpush.msrb.mxu0 %v974_v48  ;;  %993 = vmatpush.msra.mxu1 %v913_v60  ;;  %v1109_v48 = vld [vmem:[#allocation12 + $0x550] sm:$0xff] }
 0x5e7   :  { %994 = vmatmul.f32.vlgmr.msra.gmra.mxu1 %v850_v63  ;;  %1147 = vmatpush.msrb.mxu2 %v1111_v42  ;;  %v1101_v60 = vld [vmem:[#allocation12 + $0x510] sm:$0xff] }
 0x5e8   :  { %1041 = vmatpush.msrb.mxu0 %v973_v49  ;;  %1078 = vmatpush.msrb.mxu1 %v1076_v3  ;;  %v1110_v49 = vld [vmem:[#allocation12 + $0x558] sm:$0xff]  ;;  %v1195_v63 = vld [vmem:[#allocation12 + $0x6f0] sm:$0xff] }
 0x5e9   :  { %1167 = vmatpush.msrb.mxu3 %v1112_v44  ;;  %1148 = vmatpush.msrb.mxu2 %v1109_v48  ;;  %v1193_v3 = vld [vmem:[#allocation12 + $0x6d0] sm:$0xff]  ;;  %v1212_v48 = vld [vmem:[#allocation13 + $0xa0] ss:$0 sm:$0xff] }
 0x5ea   :  { %1042 = vmatpush.msrb.mxu0 %v972_v50  ;;  %1079 = vmatpush.msrb.mxu1 %v1075_v33  ;;  %v1107_v50 = vld [vmem:[#allocation12 + $0x540] sm:$0xff]  ;;  %v1209_v33 = vld [vmem:[#allocation12 + $0x7d0] sm:$0xff] }
 0x5eb   :  { %1168 = vmatpush.msrb.mxu3 %v1110_v49  ;;  %1149 = vmatpush.msrb.mxu2 %v1107_v50 }
 0x5ec   :  { %1043 = vmatpush.msrb.mxu0 %v971_v51  ;;  %1080 = vmatpush.msrb.mxu1 %v1074_v38  ;;  %v1108_v51 = vld [vmem:[#allocation12 + $0x548] sm:$0xff]  ;;  %v1192_v38 = vld [vmem:[#allocation12 + $0x6c0] sm:$0xff] }
 0x5ed   :  { %1169 = vmatpush.msrb.mxu3 %v1108_v51 }
 0x5ee   :  { %1044 = vmatpush.msrb.mxu0 %v970_v52  ;;  %1081 = vmatpush.msrb.mxu1 %v1073_v43  ;;  %v1208_v43 = vld [vmem:[#allocation12 + $0x7c0] sm:$0xff] }
 0x5ef   :  { %1170 = vmatpush.msrb.mxu3 %v1106_v25 }
 0x5f0   :  { %1045 = vmatpush.msrb.mxu0 %v969_v53  ;;  %1082 = vmatpush.msrb.mxu1 %v1072_v4  ;;  %v1035_v53 = vpop.f32.mrf.mxu3  ;;  %v1191_v4 = vld [vmem:[#allocation12 + $0x6b0] sm:$0xff] }
 0x5f2   :  { %1046 = vmatpush.msrb.mxu0 %v968_v55  ;;  %1083 = vmatpush.msrb.mxu1 %v1071_v46  ;;  %v1105_v55 = vld [vmem:[#allocation12 + $0x530] sm:$0xff] }
 0x5f3   :  { %1150 = vmatpush.msrb.mxu2 %v1105_v55  ;;  %v1207_v46 = vld [vmem:[#allocation12 + $0x7b0] sm:$0xff] }
 0x5f4   :  { %1047 = vmatpush.msrb.mxu0 %v967_v56  ;;  %1084 = vmatpush.msrb.mxu1 %v1070_v5  ;;  %v1190_v5 = vld [vmem:[#allocation12 + $0x6a0] sm:$0xff] }
 0x5f5   :  { %1151 = vmatpush.msrb.mxu2 %v1103_v28 }
 0x5f6   :  { %1048 = vmatpush.msrb.mxu0 %v966_v59  ;;  %1085 = vmatpush.msrb.mxu1 %v1069_v6  ;;  %v1206_v6 = vld [vmem:[#allocation12 + $0x7a0] sm:$0xff] }
 0x5f7   :  { %1152 = vmatpush.msrb.mxu2 %v1101_v60 }
 0x5f8   :  { %1049 = vmatpush.msrb.mxu0 %v965_v30  ;;  %1086 = vmatpush.msrb.mxu1 %v1068_v7  ;;  %v1104_v30 = vld [vmem:[#allocation12 + $0x528] sm:$0xff]  ;;  %v1189_v7 = vld [vmem:[#allocation12 + $0x690] sm:$0xff] }
 0x5f9   :  { %1171 = vmatpush.msrb.mxu3 %v1104_v30 }
 0x5fa   :  { %1050 = vmatpush.msrb.mxu0 %v964_v32  ;;  %1087 = vmatpush.msrb.mxu1 %v1067_v8  ;;  %v1102_v32 = vld [vmem:[#allocation12 + $0x518] sm:$0xff]  ;;  %v1205_v8 = vld [vmem:[#allocation12 + $0x790] sm:$0xff] }
 0x5fb   :  { %1172 = vmatpush.msrb.mxu3 %v1102_v32 }
 0x5fc   :  { %1051 = vmatpush.msrb.mxu0 %v963_v61  ;;  %1088 = vmatpush.msrb.mxu1 %v1066_v10  ;;  %v1099_v61 = vld [vmem:[#allocation12 + $0x500] sm:$0xff] }
 0x5fd   :  { %1153 = vmatpush.msrb.mxu2 %v1099_v61  ;;  %v1204_v10 = vld [vmem:[#allocation12 + $0x780] sm:$0xff] }
 0x5fe   :  { %1052 = vmatpush.msrb.mxu0 %v962_v62  ;;  %1089 = vmatpush.msrb.mxu1 %v1065_v11  ;;  %v1100_v62 = vld [vmem:[#allocation12 + $0x508] sm:$0xff]  ;;  %v1187_v11 = vld [vmem:[#allocation12 + $0x670] sm:$0xff] }
 0x5ff   :  { %1173 = vmatpush.msrb.mxu3 %v1100_v62 }
 0x600   :  { %1053 = vmatpush.msrb.mxu0 %v961_v2  ;;  %1090 = vmatpush.msrb.mxu1 %v1064_v12  ;;  %v1210_v2 = vld [vmem:[#allocation12 + $0x7e0] sm:$0xff]  ;;  %v1203_v12 = vld [vmem:[#allocation12 + $0x770] sm:$0xff] }
 0x602   :  { %1091 = vmatpush.msrb.mxu1 %v1063_v13  ;;  %1213 = vmatpush.msra.mxu0 %v1195_v63  ;;  %v1186_v13 = vld [vmem:[#allocation12 + $0x660] sm:$0xff] }
 0x604   :  { %1092 = vmatpush.msrb.mxu1 %v1062_v14  ;;  %1214 = vmatpush.msra.mxu0 %v1194_v0  ;;  %v1202_v14 = vld [vmem:[#allocation12 + $0x760] sm:$0xff] }
 0x606   :  { %1093 = vmatpush.msrb.mxu1 %v1061_v15  ;;  %1215 = vmatpush.msra.mxu0 %v1193_v3  ;;  %v1185_v15 = vld [vmem:[#allocation12 + $0x650] sm:$0xff] }
 0x608   :  { %1233 = vmatpush.msra.mxu1 %v1211_v1  ;;  %1216 = vmatpush.msra.mxu0 %v1192_v38 }
 0x60a   :  { %1234 = vmatpush.msra.mxu1 %v1210_v2  ;;  %1217 = vmatpush.msra.mxu0 %v1191_v4 }
 0x60c   :  { %1235 = vmatpush.msra.mxu1 %v1209_v33  ;;  %1218 = vmatpush.msra.mxu0 %v1190_v5 }
 0x60e   :  { %1236 = vmatpush.msra.mxu1 %v1208_v43  ;;  %1219 = vmatpush.msra.mxu0 %v1189_v7 }
 0x610   :  { %1237 = vmatpush.msra.mxu1 %v1207_v46 }
 0x612   :  { %1238 = vmatpush.msra.mxu1 %v1206_v6 }
 0x614   :  { %1239 = vmatpush.msra.mxu1 %v1205_v8 }
 0x616   :  { %1240 = vmatpush.msra.mxu1 %v1204_v10 }
 0x618   :  { %1241 = vmatpush.msra.mxu1 %v1203_v12 }
 0x61a   :  { %1242 = vmatpush.msra.mxu1 %v1202_v14 }
 0x61c   :  { %1243 = vmatpush.msra.mxu1 %v1201_v16 }
 0x61e   :  { %1244 = vmatpush.msra.mxu1 %v1200_v18 }
 0x620   :  { %1245 = vmatpush.msra.mxu1 %v1199_v24 }
 0x622   :  { %1246 = vmatpush.msra.mxu1 %v1198_v27 }
 0x624   :  { %1247 = vmatpush.msra.mxu1 %v1197_v31 }
 0x626   :  { %1248 = vmatpush.msra.mxu1 %v1196_v35 }
 0x65e   :  { %v910_v9 = vpop.f32.mrf.mxu0 }
 0x65f   :  { %1054 = vmatmul.f32.vlgmr.msrb.gmra.mxu0 %v910_v9  ;;  %v1188_v9 = vld [vmem:[#allocation12 + $0x680] sm:$0xff] }
 0x660   :  { %1220 = vmatpush.msra.mxu0 %v1188_v9 }
 0x662   :  { %1221 = vmatpush.msra.mxu0 %v1187_v11 }
 0x664   :  { %v995_v39 = vpop.f32.mrf.mxu1  ;;  %1222 = vmatpush.msra.mxu0 %v1186_v13 }
 0x665   :  { %v996_v45 = vadd.f32 %v995_v39, %v977_v37  ;;  %v1134_v37 = vperm.slane %v1132_v36, 0  ;;  %v1135_v39 = vperm.slane %v1132_v36, 1 }
 0x666   :  { %1223 = vmatpush.msra.mxu0 %v1185_v15 }
 0x667   :  { %v1016_v52 = vadd.f32 %v1015_v47, %v996_v45 }
 0x668   :  { %1224 = vmatpush.msra.mxu0 %v1184_v17 }
 0x669   :  { %v1036_v56 = vadd.f32 %v1035_v53, %v1016_v52 }
 0x66a   :  { %1225 = vmatpush.msra.mxu0 %v1183_v19 }
 0x66c   :  { %1226 = vmatpush.msra.mxu0 %v1182_v26 }
 0x66e   :  { %1227 = vmatpush.msra.mxu0 %v1181_v29 }
 0x670   :  { %1228 = vmatpush.msra.mxu0 %v1180_v34 }
 0x6dc   :  { %v1055_v54 = vpop.f32.mrf.mxu0 }
 0x6dd   :  { %v1056_v57 = vadd.f32 %v1055_v54, %v1036_v56 }
 0x6df   :  { %vm1058_vm1 = vcmp.gt.f32.partialorder %v1056_v57, 0.0  ;;  %v1059_v58 = vmul.f32 0.1, %v1056_v57 }
 0x6e1   :  { %v1060_v59 = vsel %vm1058_vm1, %v1056_v57, %v1059_v58 }
 0x6e2   :  { %1094 = vmatmul.f32.vlgmr.msrb.gmra.mxu1 %v1060_v59 }
 0x75f   :  { %v1095_v21 = vpop.f32.mrf.mxu1 }
 0x760   :  { %v1096_v22 = vadd.f32 %v1095_v21, %v1077_v20 }
 0x762   :  { %v1098_v23 = vmax.f32 %v1096_v22, 0.0 }
 0x764   :  { %1154 = vmatmul.f32.vlgmr.msrb.gmra.mxu2 %v1098_v23  ;;  %1174 = vmatmul.f32.vlgmr.msrb.gmra.mxu3 %v1098_v23 }
 0x7e7   :  { %v1155_v40 = vpop.f32.mrf.mxu2  ;;  %v1175_v41 = vpop.f32.mrf.mxu3 }
 0x7e8   :  { %v1156_v42 = vadd.f32 %v1155_v40, %v1134_v37  ;;  %v1176_v44 = vadd.f32 %v1175_v41, %v1135_v39 }
 0x7ea   :  { %v1178_v45 = vmax.f32 %v1156_v42, 0.0  ;;  %v1179_v47 = vmax.f32 %v1176_v44, 0.0 }
 0x7ec   :  { %1229 = vmatmul.f32.vlgmr.msra.gmra.mxu0 %v1178_v45  ;;  %1249 = vmatmul.f32.vlgmr.msra.gmra.mxu1 %v1179_v47 }
 0x869   :  { %v1230_v49 = vpop.f32.mrf.mxu0  ;;  %v1250_v51 = vpop.f32.mrf.mxu1 }
 0x86a   :  { %v1231_v50 = vadd.f32 %v1230_v49, %v1212_v48 }
 0x86c   :  { %v1251_v52 = vadd.f32 %v1250_v51, %v1231_v50 }
 0x86e   :  { %1253 = vst [vmem:[#allocation15] sm:$0x3] %v1251_v52 }
 0x86f   :  { %1264 = dma.vmem_to_hbm [thread:$0]  %s1260_s5, 32, %s1262_s29, [#allocation6]  }
 0x870   :  { %1477 = dma.done.wait [#allocation6], 32  }
 0x871   :  { %1478 = vsyncadd [#allocation6], 4294967264 }
 0x872   :  { %1269 = vsyncpa [#allocation5], 1 }
 0x873   :  { %1270 = vsyncpa [#allocation8], 1 }
 0x874   :  { %1271 = vsyncpa [#allocation11], 1 }
 0x875   :  { %1272 = vsyncpa [#allocation14], 1 }
 0x876   :  { %1273 = vsyncpa [#allocation6], 1 }

</bundles_post_ra>
